<compile_context>
chip_gen: v5e
topology: v5e:2x2
jax: 0.10.0
libtpu: 0.0.40
codegen_flags: <defaults>
</compile_context>

<pallas_src>
import functools
import math

import jax
import jax.numpy as jnp
from jax import lax
from jax.experimental import pallas as pl
from jax.experimental.pallas import tpu as pltpu

ACT_DTYPE = jnp.bfloat16        # storage dtype for activations & weight matrices
LN_EPS = 1e-5                   # PyTorch nn.LayerNorm default


# ----------------------------------------------------------------------------
# In-kernel helpers
# ----------------------------------------------------------------------------

def _layernorm(y, gamma, beta):
    """LayerNorm in f32 via E[y] and E[y^2] (two independent XLU reductions)."""
    m1 = jnp.mean(y, axis=-1, keepdims=True)
    m2 = jnp.mean(y * y, axis=-1, keepdims=True)
    var = jnp.maximum(m2 - m1 * m1, 0.0)
    return (y - m1) * lax.rsqrt(var + LN_EPS) * gamma + beta


def _multi_head_attention(q, k, v, bias, n_heads):
    """Per-head attention; returns concatenated head outputs (Tq, D) in f32.

    q/k/v are (T*, D) in the bf16 compute dtype.  The 1/sqrt(dh) scale is
    folded into the Q projection weights, so scores are q @ k^T (+ bias).
    """
    d_model = q.shape[-1]
    dh = d_model // n_heads
    heads = []
    for h in range(n_heads):
        lo, hi = h * dh, (h + 1) * dh
        # contract on dh of BOTH operands -> no explicit K transpose (no XLU)
        s = lax.dot_general(q[:, lo:hi], k[:, lo:hi], (((1,), (1,)), ((), ())),
                            preferred_element_type=jnp.float32)
        if bias is not None:
            s = s + bias
        m = jnp.max(s, axis=-1, keepdims=True)
        p = jnp.exp(s - m)
        p = p * pl.reciprocal(jnp.sum(p, axis=-1, keepdims=True), approx=True)
        heads.append(jnp.dot(p.astype(v.dtype), v[:, lo:hi],
                             preferred_element_type=jnp.float32))
    # caller runs ONE deep (Tq,D)x(D,D) output projection on this concat
    return jnp.concatenate(heads, axis=-1)


# ----------------------------------------------------------------------------
# Pallas kernels
# ----------------------------------------------------------------------------

def _self_mha_addln_kernel(*refs, n_heads, has_bias):
    """One batch element: LayerNorm(x + SelfMHA(x, x, x))  (fused QKV)."""
    if has_bias:
        (x_ref, bias_ref, wqkv_ref, bqkv_ref, wo_ref, bo_ref,
         g_ref, beta_ref, o_ref) = refs
        bias = bias_ref[0]                              # (T, T) additive mask
    else:
        (x_ref, wqkv_ref, bqkv_ref, wo_ref, bo_ref,
         g_ref, beta_ref, o_ref) = refs
        bias = None

    x = x_ref[0]                                        # (T, D) bf16, residual
    d_model = x.shape[-1]
    cdt = wo_ref.dtype                                  # bf16 matmul operand dtype

    # one wide (D, 3D) MXU pass for Q, K, V (softmax scale pre-folded into Q)
    qkv = (jnp.dot(x, wqkv_ref[...], preferred_element_type=jnp.float32)
           + bqkv_ref[...]).astype(cdt)
    attn = _multi_head_attention(qkv[:, :d_model], qkv[:, d_model:2 * d_model],
                                 qkv[:, 2 * d_model:], bias, n_heads)
    # single output-projection matmul instead of n_heads shallow ones
    attn = (jnp.dot(attn.astype(cdt), wo_ref[...],
                    preferred_element_type=jnp.float32) + bo_ref[...])

    y = x.astype(jnp.float32) + attn                    # residual add (f32)
    o_ref[0] = _layernorm(y, g_ref[...], beta_ref[...]).astype(o_ref.dtype)


def _cross_mha_addln_kernel(q_ref, mem_ref, wq_ref, bq_ref, wkv_ref, bkv_ref,
                            wo_ref, bo_ref, g_ref, beta_ref, o_ref, *, n_heads):
    """One (batch, Tq-tile): LayerNorm(x + MHA(x, memory, memory)), no mask."""
    x = q_ref[0]                                        # (TQ, D) bf16, residual
    mem = mem_ref[0]                                    # (S, D) bf16
    d_model = x.shape[-1]
    cdt = wo_ref.dtype

    q = (jnp.dot(x, wq_ref[...], preferred_element_type=jnp.float32)
         + bq_ref[...]).astype(cdt)
    # TODO(synk): for long memory, hoist the KV projection into its own kernel
    # (or flash-tile over S) so it is not recomputed per Tq tile.
    kv = (jnp.dot(mem, wkv_ref[...], preferred_element_type=jnp.float32)
          + bkv_ref[...]).astype(cdt)

    attn = _multi_head_attention(q, kv[:, :d_model], kv[:, d_model:],
                                 None, n_heads)
    attn = (jnp.dot(attn.astype(cdt), wo_ref[...],
                    preferred_element_type=jnp.float32) + bo_ref[...])

    y = x.astype(jnp.float32) + attn
    o_ref[0] = _layernorm(y, g_ref[...], beta_ref[...]).astype(o_ref.dtype)


def _ffn_addln_kernel(x_ref, w1_ref, b1_ref, w2_ref, b2_ref, g_ref, beta_ref,
                      o_ref):
    """LayerNorm(x + w2(relu(w1(x)))) on a (TM, D) row tile."""
    x = x_ref[...]                                      # (TM, D) bf16
    h = jnp.dot(x, w1_ref[...], preferred_element_type=jnp.float32) + b1_ref[...]
    h = jnp.maximum(h, 0.0).astype(w2_ref.dtype)        # relu, bf16 for 2nd matmul
    y = (x.astype(jnp.float32)
         + jnp.dot(h, w2_ref[...], preferred_element_type=jnp.float32)
         + b2_ref[...])
    o_ref[...] = _layernorm(y, g_ref[...], beta_ref[...]).astype(o_ref.dtype)


# ----------------------------------------------------------------------------
# Wrappers
# ----------------------------------------------------------------------------

def _pick_tile(n, cap=512):
    """Largest multiple-of-8 divisor of n that is <= cap (falls back to n)."""
    best = None
    t = 8
    while t <= min(n, cap):
        if n % t == 0:
            best = t
        t += 8
    return best if best is not None else n


def _nbytes(shape, dtype):
    n = 1
    for s in shape:
        n *= int(s)
    return n * jnp.dtype(dtype).itemsize


def _vmem_limit(block_bytes):
    """Explicit scoped-VMEM limit from the per-grid-step block footprint."""
    need = 4 * block_bytes          # double-buffered blocks + intermediates
    return int(min(max(need, 32 << 20), 64 << 20))


def self_attn_add_layernorm(x, ap, n_heads, attn_bias, gamma2d, beta2d):
    """Fused self-MHA (+optional additive mask) + residual + LayerNorm."""
    B, T, D = x.shape
    has_bias = attn_bias is not None

    args = [x]
    in_specs = [pl.BlockSpec((1, T, D), lambda b: (b, 0, 0))]   # x / residual
    if has_bias:
        # single shared (1, T, T) additive-bias tile (never (B*H, T, T))
        bias = jnp.broadcast_to(attn_bias, (1, T, T)).astype(jnp.float32)
        args.append(bias)
        in_specs.append(pl.BlockSpec((1, T, T), lambda b: (0, 0, 0)))
    args += [ap["wqkv_t"], ap["bqkv"], ap["wo_t"], ap["bo"], gamma2d, beta2d]
    in_specs += [
        pl.BlockSpec((D, 3 * D), lambda b: (0, 0)),   # [Wq*scale; Wk; Wv]^T
        pl.BlockSpec((1, 3 * D), lambda b: (0, 0)),   # [bq*scale; bk; bv]
        pl.BlockSpec((D, D), lambda b: (0, 0)),       # Wo^T
        pl.BlockSpec((1, D), lambda b: (0, 0)),       # bo
        pl.BlockSpec((1, D), lambda b: (0, 0)),       # LN gamma
        pl.BlockSpec((1, D), lambda b: (0, 0)),       # LN beta
    ]
    blk = sum(_nbytes(s.block_shape, a.dtype) for s, a in zip(in_specs, args))
    blk += _nbytes((1, T, D), ACT_DTYPE)

    kern = functools.partial(_self_mha_addln_kernel,
                             n_heads=n_heads, has_bias=has_bias)
    return pl.pallas_call(
        kern,
        out_shape=jax.ShapeDtypeStruct((B, T, D), ACT_DTYPE),
        grid=(B,),
        in_specs=in_specs,
        out_specs=pl.BlockSpec((1, T, D), lambda b: (b, 0, 0)),
        compiler_params=pltpu.CompilerParams(
            dimension_semantics=("parallel",),
            vmem_limit_bytes=_vmem_limit(blk)),
    )(*args)


def cross_attn_add_layernorm(x, memory, ap, n_heads, gamma2d, beta2d):
    """Fused cross-MHA (no mask, no bias input) + residual + LayerNorm."""
    B, T, D = x.shape
    S = memory.shape[1]
    TQ = _pick_tile(T, cap=256)       # Tq tile axis: extra "parallel" steps

    in_specs = [
        pl.BlockSpec((1, TQ, D), lambda b, i: (b, i, 0)),   # query tile / residual
        pl.BlockSpec((1, S, D), lambda b, i: (b, 0, 0)),    # memory (K/V source)
        pl.BlockSpec((D, D), lambda b, i: (0, 0)),          # Wq^T * scale
        pl.BlockSpec((1, D), lambda b, i: (0, 0)),          # bq * scale
        pl.BlockSpec((D, 2 * D), lambda b, i: (0, 0)),      # Wkv^T
        pl.BlockSpec((1, 2 * D), lambda b, i: (0, 0)),      # bkv
        pl.BlockSpec((D, D), lambda b, i: (0, 0)),          # Wo^T
        pl.BlockSpec((1, D), lambda b, i: (0, 0)),          # bo
        pl.BlockSpec((1, D), lambda b, i: (0, 0)),          # LN gamma
        pl.BlockSpec((1, D), lambda b, i: (0, 0)),          # LN beta
    ]
    args = [x, memory, ap["wq_t"], ap["bq"], ap["wkv_t"], ap["bkv"],
            ap["wo_t"], ap["bo"], gamma2d, beta2d]
    blk = sum(_nbytes(s.block_shape, a.dtype) for s, a in zip(in_specs, args))
    blk += _nbytes((1, TQ, D), ACT_DTYPE)

    kern = functools.partial(_cross_mha_addln_kernel, n_heads=n_heads)
    return pl.pallas_call(
        kern,
        out_shape=jax.ShapeDtypeStruct((B, T, D), ACT_DTYPE),
        grid=(B, T // TQ),
        in_specs=in_specs,
        out_specs=pl.BlockSpec((1, TQ, D), lambda b, i: (b, i, 0)),
        compiler_params=pltpu.CompilerParams(
            dimension_semantics=("parallel", "parallel"),
            vmem_limit_bytes=_vmem_limit(blk)),
    )(*args)


def ffn_add_layernorm(x2d, lp, out_dtype):
    """Fused FFN + residual + LayerNorm, M-tiled parallel grid."""
    M, D = x2d.shape
    d_ff = lp["w1_t"].shape[1]
    TM = _pick_tile(M, cap=512)

    in_specs = [
        pl.BlockSpec((TM, D), lambda i: (i, 0)),
        pl.BlockSpec((D, d_ff), lambda i: (0, 0)),
        pl.BlockSpec((1, d_ff), lambda i: (0, 0)),
        pl.BlockSpec((d_ff, D), lambda i: (0, 0)),
        pl.BlockSpec((1, D), lambda i: (0, 0)),
        pl.BlockSpec((1, D), lambda i: (0, 0)),
        pl.BlockSpec((1, D), lambda i: (0, 0)),
    ]
    args = [x2d, lp["w1_t"], lp["b1"], lp["w2_t"], lp["b2"],
            lp["norm3_g2d"], lp["norm3_b2d"]]
    blk = sum(_nbytes(s.block_shape, a.dtype) for s, a in zip(in_specs, args))
    blk += _nbytes((TM, D), out_dtype)

    return pl.pallas_call(
        _ffn_addln_kernel,
        out_shape=jax.ShapeDtypeStruct((M, D), out_dtype),
        grid=(M // TM,),
        in_specs=in_specs,
        out_specs=pl.BlockSpec((TM, D), lambda i: (i, 0)),
        compiler_params=pltpu.CompilerParams(
            dimension_semantics=("parallel",),
            vmem_limit_bytes=_vmem_limit(blk)),
    )(*args)


def decoder_layer(tgt, memory, lp, n_heads, tgt_bias, out_dtype):
    B, T, D = tgt.shape
    # self-attention + residual + norm1        (1 fused pallas_call)
    tgt = self_attn_add_layernorm(tgt, lp["self_attn"], n_heads, tgt_bias,
                                  lp["norm1_g2d"], lp["norm1_b2d"])
    # cross-attention + residual + norm2       (1 fused pallas_call, no mask)
    tgt = cross_attn_add_layernorm(tgt, memory, lp["cross_attn"], n_heads,
                                   lp["norm2_g2d"], lp["norm2_b2d"])
    # feed-forward + residual + norm3          (1 fused pallas_call)
    tgt = ffn_add_layernorm(tgt.reshape(B * T, D), lp, out_dtype).reshape(B, T, D)
    return tgt


def decoder_forward(tgt_ids, memory, params, n_heads, tgt_mask=None):
    d_model = params["embedding"].shape[1]
    B, T = tgt_ids.shape
    # Embedding gather + sqrt(d_model) scale + positional encoding: left to XLA
    # (single fused gather+mul+add+cast) — no dedicated Pallas call and no extra
    # HBM round-trip of the (B, T, D) activation.  Dropouts are identity.
    x = (jnp.take(params["embedding"], tgt_ids, axis=0) * math.sqrt(d_model)
         + params["pe"][:T][None]).astype(ACT_DTYPE)
    memory = memory.astype(ACT_DTYPE)                  # bf16 K/V source
    # TODO(synk): with d_model=32 the output lane width is <128 (masked stores);
    # for production use d_model as a multiple of 128 for lane-dense tiles.
    n_layers = len(params["layers"])
    for li, lp in enumerate(params["layers"]):
        out_dtype = jnp.float32 if li == n_layers - 1 else ACT_DTYPE
        x = decoder_layer(x, memory, lp, n_heads, tgt_mask, out_dtype)
    return x


# ----------------------------------------------------------------------------
# Deterministic parameter construction (PyTorch layout) + one-time preparation
# ----------------------------------------------------------------------------

def make_positional_encoding(max_len, d_model):
    position = jnp.arange(max_len, dtype=jnp.float32)[:, None]
    div_term = jnp.exp(jnp.arange(0, d_model, 2, dtype=jnp.float32)
                       * (-math.log(10000.0) / d_model))
    pe = jnp.zeros((max_len, d_model), jnp.float32)
    pe = pe.at[:, 0::2].set(jnp.sin(position * div_term))
    pe = pe.at[:, 1::2].set(jnp.cos(position * div_term))
    return pe


def init_params(key, output_dim, d_model, n_layers, d_ff, max_len):
    def nrm(k, shape, s=0.05):
        return jax.random.normal(k, shape, jnp.float32) * s

    keys = iter(jax.random.split(key, 4 + n_layers * 12))
    params = {
        "embedding": nrm(next(keys), (output_dim, d_model), 1.0),
        "pe": make_positional_encoding(max_len, d_model),
        "layers": [],
    }
    for _ in range(n_layers):
        lp = {
            "self_attn": {
                "in_w": nrm(next(keys), (3 * d_model, d_model)),   # [Wq; Wk; Wv]
                "in_b": nrm(next(keys), (3 * d_model,)),
                "out_w": nrm(next(keys), (d_model, d_model)),
                "out_b": nrm(next(keys), (d_model,)),
            },
            "cross_attn": {
                "in_w": nrm(next(keys), (3 * d_model, d_model)),
                "in_b": nrm(next(keys), (3 * d_model,)),
                "out_w": nrm(next(keys), (d_model, d_model)),
                "out_b": nrm(next(keys), (d_model,)),
            },
            "ffn_w1": nrm(next(keys), (d_ff, d_model)),
            "ffn_b1": nrm(next(keys), (d_ff,)),
            "ffn_w2": nrm(next(keys), (d_model, d_ff)),
            "ffn_b2": nrm(next(keys), (d_model,)),
            "norm1_g": jnp.ones((d_model,), jnp.float32),
            "norm1_b": jnp.zeros((d_model,), jnp.float32),
            "norm2_g": jnp.ones((d_model,), jnp.float32),
            "norm2_b": jnp.zeros((d_model,), jnp.float32),
            "norm3_g": jnp.ones((d_model,), jnp.float32),
            "norm3_b": jnp.zeros((d_model,), jnp.float32),
        }
        params["layers"].append(lp)
    return params


def prepare_params(raw, n_heads):
    """One-time weight transposes, softmax-scale folding and bf16 casts.

    NOT in the per-call forward path.  LN params / projection biases stay f32
    (added to f32 accumulators); weight matrices are bf16 MXU operands.
    """
    D = raw["embedding"].shape[1]
    dh = D // n_heads
    scale = 1.0 / math.sqrt(dh)

    def prep_self(a):
        w, b = a["in_w"], a["in_b"]                     # (3D, D), (3D,)
        wqkv_t = jnp.concatenate([w[:D].T * scale, w[D:2 * D].T, w[2 * D:].T],
                                 axis=1)                # (D, 3D), scale folded
        bqkv = jnp.concatenate([b[:D] * scale, b[D:]]).reshape(1, 3 * D)
        return {
            "wqkv_t": wqkv_t.astype(ACT_DTYPE),
            "bqkv": bqkv.astype(jnp.float32),
            "wo_t": a["out_w"].T.astype(ACT_DTYPE),
            "bo": a["out_b"].reshape(1, D).astype(jnp.float32),
        }

    def prep_cross(a):
        w, b = a["in_w"], a["in_b"]
        return {
            "wq_t": (w[:D].T * scale).astype(ACT_DTYPE),
            "bq": (b[:D] * scale).reshape(1, D).astype(jnp.float32),
            "wkv_t": w[D:].T.astype(ACT_DTYPE),
            "bkv": b[D:].reshape(1, 2 * D).astype(jnp.float32),
            "wo_t": a["out_w"].T.astype(ACT_DTYPE),
            "bo": a["out_b"].reshape(1, D).astype(jnp.float32),
        }

    out = {"embedding": raw["embedding"], "pe": raw["pe"], "layers": []}
    for lp in raw["layers"]:
        d_ff = lp["ffn_w1"].shape[0]
        out["layers"].append({
            "self_attn": prep_self(lp["self_attn"]),
            "cross_attn": prep_cross(lp["cross_attn"]),
            "w1_t": lp["ffn_w1"].T.astype(ACT_DTYPE),            # (D, d_ff)
            "b1": lp["ffn_b1"].reshape(1, d_ff).astype(jnp.float32),
            "w2_t": lp["ffn_w2"].T.astype(ACT_DTYPE),            # (d_ff, D)
            "b2": lp["ffn_b2"].reshape(1, D).astype(jnp.float32),
            "norm1_g2d": lp["norm1_g"].reshape(1, D),
            "norm1_b2d": lp["norm1_b"].reshape(1, D),
            "norm2_g2d": lp["norm2_g"].reshape(1, D),
            "norm2_b2d": lp["norm2_b"].reshape(1, D),
            "norm3_g2d": lp["norm3_g"].reshape(1, D),
            "norm3_b2d": lp["norm3_b"].reshape(1, D),
        })
    return out


# ----------------------------------------------------------------------------
# Demo
# ----------------------------------------------------------------------------

if __name__ == "__main__":
    output_dim = 50     # vocab size
    d_model = 32
    n_layers = 2
    n_heads = 4
    d_ff = 64
    max_len = 64
    B, T, S_mem = 2, 8, 8

    root = jax.random.PRNGKey(0)
    k_param, k_ids, k_mem = jax.random.split(root, 3)

    raw_params = init_params(k_param, output_dim, d_model, n_layers, d_ff, max_len)
    params = prepare_params(raw_params, n_heads)   # pre-transposed/scaled, bf16

    tgt_ids = jax.random.randint(k_ids, (B, T), 0, output_dim, dtype=jnp.int32)
    memory = jax.random.normal(k_mem, (B, S_mem, d_model), jnp.float32)

    # causal target mask (additive float mask, PyTorch attn_mask convention)
    causal = jnp.triu(jnp.ones((T, T), jnp.bool_), k=1)
    tgt_mask = jnp.where(causal, -1e9, 0.0).astype(jnp.float32)[None]  # (1, T, T)

    fwd = jax.jit(decoder_forward, static_argnums=(3,))
    out = fwd(tgt_ids, memory, params, n_heads, tgt_mask)
    out = jax.block_until_ready(out)

    assert out.shape == (B, T, d_model)
    assert out.dtype == jnp.float32
    assert bool(jnp.all(jnp.isfinite(out)))
    print("KERNEL_OK")
</pallas_src>

<mosaic_0001>
module attributes {stable_mosaic.version = 11 : i64} {
  func.func @_self_mha_addln_kernel(%arg0: i32, %arg1: memref<1x8x32xbf16, #tpu.memory_space<vmem>>, %arg2: memref<1x8x8xf32, #tpu.memory_space<vmem>>, %arg3: memref<32x96xbf16, #tpu.memory_space<vmem>>, %arg4: memref<1x96xf32, #tpu.memory_space<vmem>>, %arg5: memref<32x32xbf16, #tpu.memory_space<vmem>>, %arg6: memref<1x32xf32, #tpu.memory_space<vmem>>, %arg7: memref<1x32xf32, #tpu.memory_space<vmem>>, %arg8: memref<1x32xf32, #tpu.memory_space<vmem>>, %arg9: memref<1x8x32xbf16, #tpu.memory_space<vmem>>) attributes {dimension_semantics = [#tpu.dimension_semantics<parallel>], iteration_bounds = array<i64: 2>, scalar_prefetch = 0 : i64, scratch_operands = 0 : i64, tpu.core_type = #tpu.core_type<tc>, window_params = [{transform_indices = @transform_0, window_bounds = array<i64: 1, 8, 32>}, {pipeline_mode = #tpu.pipeline_mode<synchronous>, transform_indices = @transform_1, window_bounds = array<i64: 1, 8, 8>}, {pipeline_mode = #tpu.pipeline_mode<synchronous>, transform_indices = @transform_2, window_bounds = array<i64: 32, 96>}, {pipeline_mode = #tpu.pipeline_mode<synchronous>, transform_indices = @transform_3, window_bounds = array<i64: 1, 96>}, {pipeline_mode = #tpu.pipeline_mode<synchronous>, transform_indices = @transform_4, window_bounds = array<i64: 32, 32>}, {pipeline_mode = #tpu.pipeline_mode<synchronous>, transform_indices = @transform_5, window_bounds = array<i64: 1, 32>}, {pipeline_mode = #tpu.pipeline_mode<synchronous>, transform_indices = @transform_6, window_bounds = array<i64: 1, 32>}, {pipeline_mode = #tpu.pipeline_mode<synchronous>, transform_indices = @transform_7, window_bounds = array<i64: 1, 32>}, {transform_indices = @transform_8, window_bounds = array<i64: 1, 8, 32>}]} {
    %c0 = arith.constant 0 : index
    %c0_0 = arith.constant 0 : index
    %c0_1 = arith.constant 0 : index
    %0 = vector.load %arg2[%c0, %c0_0, %c0_1] : memref<1x8x8xf32, #tpu.memory_space<vmem>>, vector<1x8x8xf32>
    %1 = vector.shape_cast %0 : vector<1x8x8xf32> to vector<8x8xf32>
    %c0_2 = arith.constant 0 : index
    %c0_3 = arith.constant 0 : index
    %c0_4 = arith.constant 0 : index
    %2 = vector.load %arg1[%c0_2, %c0_3, %c0_4] : memref<1x8x32xbf16, #tpu.memory_space<vmem>>, vector<1x8x32xbf16>
    %3 = vector.shape_cast %2 : vector<1x8x32xbf16> to vector<8x32xbf16>
    %c0_5 = arith.constant 0 : index
    %c0_6 = arith.constant 0 : index
    %4 = vector.load %arg3[%c0_5, %c0_6] : memref<32x96xbf16, #tpu.memory_space<vmem>>, vector<32x96xbf16>
    %cst = arith.constant dense<0.000000e+00> : vector<8x96xf32>
    %5 = tpu.matmul %3, %4, %cst {dimension_numbers = #tpu.dot_dimension_numbers<[1], [0], [0], [1], [0, 0, 1, 1], [], []>} : vector<8x32xbf16>, vector<32x96xbf16>, vector<8x96xf32> -> vector<8x96xf32>
    %c0_7 = arith.constant 0 : index
    %c0_8 = arith.constant 0 : index
    %6 = vector.load %arg4[%c0_7, %c0_8] : memref<1x96xf32, #tpu.memory_space<vmem>>, vector<1x96xf32>
    %7 = vector.broadcast %6 : vector<1x96xf32> to vector<8x96xf32>
    %8 = arith.addf %5, %7 : vector<8x96xf32>
    %9 = arith.truncf %8 : vector<8x96xf32> to vector<8x96xbf16>
    %10 = vector.extract_strided_slice %9 {offsets = [0, 0], sizes = [8, 32], strides = [1, 1]} : vector<8x96xbf16> to vector<8x32xbf16>
    %11 = vector.extract_strided_slice %9 {offsets = [0, 32], sizes = [8, 32], strides = [1, 1]} : vector<8x96xbf16> to vector<8x32xbf16>
    %12 = vector.extract_strided_slice %9 {offsets = [0, 64], sizes = [8, 32], strides = [1, 1]} : vector<8x96xbf16> to vector<8x32xbf16>
    %13 = vector.extract_strided_slice %10 {offsets = [0, 0], sizes = [8, 8], strides = [1, 1]} : vector<8x32xbf16> to vector<8x8xbf16>
    %14 = vector.extract_strided_slice %11 {offsets = [0, 0], sizes = [8, 8], strides = [1, 1]} : vector<8x32xbf16> to vector<8x8xbf16>
    %cst_9 = arith.constant dense<0.000000e+00> : vector<8x8xf32>
    %15 = tpu.matmul %13, %14, %cst_9 {dimension_numbers = #tpu.dot_dimension_numbers<[1], [1], [0], [0], [0, 0, 1, 0], [], []>} : vector<8x8xbf16>, vector<8x8xbf16>, vector<8x8xf32> -> vector<8x8xf32>
    %16 = arith.addf %15, %1 : vector<8x8xf32>
    %cst_10 = arith.constant dense<0xFF800000> : vector<8xf32>
    %17 = vector.multi_reduction <maximumf>, %16, %cst_10 [1] : vector<8x8xf32> to vector<8xf32>
    %18 = vector.shape_cast %17 : vector<8xf32> to vector<8x1xf32>
    %19 = vector.broadcast %18 : vector<8x1xf32> to vector<8x8xf32>
    %20 = arith.subf %16, %19 : vector<8x8xf32>
    %21 = math.exp %20 : vector<8x8xf32>
    %cst_11 = arith.constant dense<0.000000e+00> : vector<8xf32>
    %22 = vector.multi_reduction <add>, %21, %cst_11 [1] : vector<8x8xf32> to vector<8xf32>
    %23 = vector.shape_cast %22 : vector<8xf32> to vector<8x1xf32>
    %24 = tpu.reciprocal %23 {approx = true} : vector<8x1xf32> -> vector<8x1xf32>
    %25 = vector.broadcast %24 : vector<8x1xf32> to vector<8x8xf32>
    %26 = arith.mulf %21, %25 : vector<8x8xf32>
    %27 = arith.truncf %26 : vector<8x8xf32> to vector<8x8xbf16>
    %28 = vector.extract_strided_slice %12 {offsets = [0, 0], sizes = [8, 8], strides = [1, 1]} : vector<8x32xbf16> to vector<8x8xbf16>
    %cst_12 = arith.constant dense<0.000000e+00> : vector<8x8xf32>
    %29 = tpu.matmul %27, %28, %cst_12 {dimension_numbers = #tpu.dot_dimension_numbers<[1], [0], [0], [1], [0, 0, 1, 1], [], []>} : vector<8x8xbf16>, vector<8x8xbf16>, vector<8x8xf32> -> vector<8x8xf32>
    %30 = vector.extract_strided_slice %10 {offsets = [0, 8], sizes = [8, 8], strides = [1, 1]} : vector<8x32xbf16> to vector<8x8xbf16>
    %31 = vector.extract_strided_slice %11 {offsets = [0, 8], sizes = [8, 8], strides = [1, 1]} : vector<8x32xbf16> to vector<8x8xbf16>
    %cst_13 = arith.constant dense<0.000000e+00> : vector<8x8xf32>
    %32 = tpu.matmul %30, %31, %cst_13 {dimension_numbers = #tpu.dot_dimension_numbers<[1], [1], [0], [0], [0, 0, 1, 0], [], []>} : vector<8x8xbf16>, vector<8x8xbf16>, vector<8x8xf32> -> vector<8x8xf32>
    %33 = arith.addf %32, %1 : vector<8x8xf32>
    %cst_14 = arith.constant dense<0xFF800000> : vector<8xf32>
    %34 = vector.multi_reduction <maximumf>, %33, %cst_14 [1] : vector<8x8xf32> to vector<8xf32>
    %35 = vector.shape_cast %34 : vector<8xf32> to vector<8x1xf32>
    %36 = vector.broadcast %35 : vector<8x1xf32> to vector<8x8xf32>
    %37 = arith.subf %33, %36 : vector<8x8xf32>
    %38 = math.exp %37 : vector<8x8xf32>
    %cst_15 = arith.constant dense<0.000000e+00> : vector<8xf32>
    %39 = vector.multi_reduction <add>, %38, %cst_15 [1] : vector<8x8xf32> to vector<8xf32>
    %40 = vector.shape_cast %39 : vector<8xf32> to vector<8x1xf32>
    %41 = tpu.reciprocal %40 {approx = true} : vector<8x1xf32> -> vector<8x1xf32>
    %42 = vector.broadcast %41 : vector<8x1xf32> to vector<8x8xf32>
    %43 = arith.mulf %38, %42 : vector<8x8xf32>
    %44 = arith.truncf %43 : vector<8x8xf32> to vector<8x8xbf16>
    %45 = vector.extract_strided_slice %12 {offsets = [0, 8], sizes = [8, 8], strides = [1, 1]} : vector<8x32xbf16> to vector<8x8xbf16>
    %cst_16 = arith.constant dense<0.000000e+00> : vector<8x8xf32>
    %46 = tpu.matmul %44, %45, %cst_16 {dimension_numbers = #tpu.dot_dimension_numbers<[1], [0], [0], [1], [0, 0, 1, 1], [], []>} : vector<8x8xbf16>, vector<8x8xbf16>, vector<8x8xf32> -> vector<8x8xf32>
    %47 = vector.extract_strided_slice %10 {offsets = [0, 16], sizes = [8, 8], strides = [1, 1]} : vector<8x32xbf16> to vector<8x8xbf16>
    %48 = vector.extract_strided_slice %11 {offsets = [0, 16], sizes = [8, 8], strides = [1, 1]} : vector<8x32xbf16> to vector<8x8xbf16>
    %cst_17 = arith.constant dense<0.000000e+00> : vector<8x8xf32>
    %49 = tpu.matmul %47, %48, %cst_17 {dimension_numbers = #tpu.dot_dimension_numbers<[1], [1], [0], [0], [0, 0, 1, 0], [], []>} : vector<8x8xbf16>, vector<8x8xbf16>, vector<8x8xf32> -> vector<8x8xf32>
    %50 = arith.addf %49, %1 : vector<8x8xf32>
    %cst_18 = arith.constant dense<0xFF800000> : vector<8xf32>
    %51 = vector.multi_reduction <maximumf>, %50, %cst_18 [1] : vector<8x8xf32> to vector<8xf32>
    %52 = vector.shape_cast %51 : vector<8xf32> to vector<8x1xf32>
    %53 = vector.broadcast %52 : vector<8x1xf32> to vector<8x8xf32>
    %54 = arith.subf %50, %53 : vector<8x8xf32>
    %55 = math.exp %54 : vector<8x8xf32>
    %cst_19 = arith.constant dense<0.000000e+00> : vector<8xf32>
    %56 = vector.multi_reduction <add>, %55, %cst_19 [1] : vector<8x8xf32> to vector<8xf32>
    %57 = vector.shape_cast %56 : vector<8xf32> to vector<8x1xf32>
    %58 = tpu.reciprocal %57 {approx = true} : vector<8x1xf32> -> vector<8x1xf32>
    %59 = vector.broadcast %58 : vector<8x1xf32> to vector<8x8xf32>
    %60 = arith.mulf %55, %59 : vector<8x8xf32>
    %61 = arith.truncf %60 : vector<8x8xf32> to vector<8x8xbf16>
    %62 = vector.extract_strided_slice %12 {offsets = [0, 16], sizes = [8, 8], strides = [1, 1]} : vector<8x32xbf16> to vector<8x8xbf16>
    %cst_20 = arith.constant dense<0.000000e+00> : vector<8x8xf32>
    %63 = tpu.matmul %61, %62, %cst_20 {dimension_numbers = #tpu.dot_dimension_numbers<[1], [0], [0], [1], [0, 0, 1, 1], [], []>} : vector<8x8xbf16>, vector<8x8xbf16>, vector<8x8xf32> -> vector<8x8xf32>
    %64 = vector.extract_strided_slice %10 {offsets = [0, 24], sizes = [8, 8], strides = [1, 1]} : vector<8x32xbf16> to vector<8x8xbf16>
    %65 = vector.extract_strided_slice %11 {offsets = [0, 24], sizes = [8, 8], strides = [1, 1]} : vector<8x32xbf16> to vector<8x8xbf16>
    %cst_21 = arith.constant dense<0.000000e+00> : vector<8x8xf32>
    %66 = tpu.matmul %64, %65, %cst_21 {dimension_numbers = #tpu.dot_dimension_numbers<[1], [1], [0], [0], [0, 0, 1, 0], [], []>} : vector<8x8xbf16>, vector<8x8xbf16>, vector<8x8xf32> -> vector<8x8xf32>
    %67 = arith.addf %66, %1 : vector<8x8xf32>
    %cst_22 = arith.constant dense<0xFF800000> : vector<8xf32>
    %68 = vector.multi_reduction <maximumf>, %67, %cst_22 [1] : vector<8x8xf32> to vector<8xf32>
    %69 = vector.shape_cast %68 : vector<8xf32> to vector<8x1xf32>
    %70 = vector.broadcast %69 : vector<8x1xf32> to vector<8x8xf32>
    %71 = arith.subf %67, %70 : vector<8x8xf32>
    %72 = math.exp %71 : vector<8x8xf32>
    %cst_23 = arith.constant dense<0.000000e+00> : vector<8xf32>
    %73 = vector.multi_reduction <add>, %72, %cst_23 [1] : vector<8x8xf32> to vector<8xf32>
    %74 = vector.shape_cast %73 : vector<8xf32> to vector<8x1xf32>
    %75 = tpu.reciprocal %74 {approx = true} : vector<8x1xf32> -> vector<8x1xf32>
    %76 = vector.broadcast %75 : vector<8x1xf32> to vector<8x8xf32>
    %77 = arith.mulf %72, %76 : vector<8x8xf32>
    %78 = arith.truncf %77 : vector<8x8xf32> to vector<8x8xbf16>
    %79 = vector.extract_strided_slice %12 {offsets = [0, 24], sizes = [8, 8], strides = [1, 1]} : vector<8x32xbf16> to vector<8x8xbf16>
    %cst_24 = arith.constant dense<0.000000e+00> : vector<8x8xf32>
    %80 = tpu.matmul %78, %79, %cst_24 {dimension_numbers = #tpu.dot_dimension_numbers<[1], [0], [0], [1], [0, 0, 1, 1], [], []>} : vector<8x8xbf16>, vector<8x8xbf16>, vector<8x8xf32> -> vector<8x8xf32>
    %81 = tpu.concatenate %29, %46, %63, %80 in 1 : vector<8x8xf32>, vector<8x8xf32>, vector<8x8xf32>, vector<8x8xf32> -> vector<8x32xf32>
    %82 = arith.truncf %81 : vector<8x32xf32> to vector<8x32xbf16>
    %c0_25 = arith.constant 0 : index
    %c0_26 = arith.constant 0 : index
    %83 = vector.load %arg5[%c0_25, %c0_26] : memref<32x32xbf16, #tpu.memory_space<vmem>>, vector<32x32xbf16>
    %cst_27 = arith.constant dense<0.000000e+00> : vector<8x32xf32>
    %84 = tpu.matmul %82, %83, %cst_27 {dimension_numbers = #tpu.dot_dimension_numbers<[1], [0], [0], [1], [0, 0, 1, 1], [], []>} : vector<8x32xbf16>, vector<32x32xbf16>, vector<8x32xf32> -> vector<8x32xf32>
    %c0_28 = arith.constant 0 : index
    %c0_29 = arith.constant 0 : index
    %85 = vector.load %arg6[%c0_28, %c0_29] : memref<1x32xf32, #tpu.memory_space<vmem>>, vector<1x32xf32>
    %86 = vector.broadcast %85 : vector<1x32xf32> to vector<8x32xf32>
    %87 = arith.addf %84, %86 : vector<8x32xf32>
    %88 = arith.extf %3 : vector<8x32xbf16> to vector<8x32xf32>
    %89 = arith.addf %88, %87 : vector<8x32xf32>
    %c0_30 = arith.constant 0 : index
    %c0_31 = arith.constant 0 : index
    %90 = vector.load %arg7[%c0_30, %c0_31] : memref<1x32xf32, #tpu.memory_space<vmem>>, vector<1x32xf32>
    %c0_32 = arith.constant 0 : index
    %c0_33 = arith.constant 0 : index
    %91 = vector.load %arg8[%c0_32, %c0_33] : memref<1x32xf32, #tpu.memory_space<vmem>>, vector<1x32xf32>
    %cst_34 = arith.constant dense<0.000000e+00> : vector<8xf32>
    %92 = vector.multi_reduction <add>, %89, %cst_34 [1] : vector<8x32xf32> to vector<8xf32>
    %93 = vector.shape_cast %92 : vector<8xf32> to vector<8x1xf32>
    %cst_35 = arith.constant 3.200000e+01 : f32
    %94 = vector.broadcast %cst_35 : f32 to vector<8x1xf32>
    %95 = arith.divf %93, %94 : vector<8x1xf32>
    %96 = arith.mulf %89, %89 : vector<8x32xf32>
    %cst_36 = arith.constant dense<0.000000e+00> : vector<8xf32>
    %97 = vector.multi_reduction <add>, %96, %cst_36 [1] : vector<8x32xf32> to vector<8xf32>
    %98 = vector.shape_cast %97 : vector<8xf32> to vector<8x1xf32>
    %cst_37 = arith.constant 3.200000e+01 : f32
    %99 = vector.broadcast %cst_37 : f32 to vector<8x1xf32>
    %100 = arith.divf %98, %99 : vector<8x1xf32>
    %101 = arith.mulf %95, %95 : vector<8x1xf32>
    %102 = arith.subf %100, %101 : vector<8x1xf32>
    %cst_38 = arith.constant 0.000000e+00 : f32
    %103 = vector.broadcast %cst_38 : f32 to vector<8x1xf32>
    %104 = arith.maximumf %102, %103 : vector<8x1xf32>
    %105 = vector.broadcast %95 : vector<8x1xf32> to vector<8x32xf32>
    %106 = arith.subf %89, %105 : vector<8x32xf32>
    %cst_39 = arith.constant 9.99999974E-6 : f32
    %107 = vector.broadcast %cst_39 : f32 to vector<8x1xf32>
    %108 = arith.addf %104, %107 : vector<8x1xf32>
    %109 = math.rsqrt %108 : vector<8x1xf32>
    %110 = vector.broadcast %109 : vector<8x1xf32> to vector<8x32xf32>
    %111 = arith.mulf %106, %110 : vector<8x32xf32>
    %112 = vector.broadcast %90 : vector<1x32xf32> to vector<8x32xf32>
    %113 = arith.mulf %111, %112 : vector<8x32xf32>
    %114 = vector.broadcast %91 : vector<1x32xf32> to vector<8x32xf32>
    %115 = arith.addf %113, %114 : vector<8x32xf32>
    %116 = arith.truncf %115 : vector<8x32xf32> to vector<8x32xbf16>
    %c0_40 = arith.constant 0 : index
    %c0_41 = arith.constant 0 : index
    %c0_42 = arith.constant 0 : index
    %117 = vector.load %arg9[%c0_40, %c0_41, %c0_42] : memref<1x8x32xbf16, #tpu.memory_space<vmem>>, vector<1x8x32xbf16>
    %118 = vector.shape_cast %117 : vector<1x8x32xbf16> to vector<8x32xbf16>
    %119 = vector.shape_cast %116 : vector<8x32xbf16> to vector<1x8x32xbf16>
    tpu.vector_store %arg9[%c0_40, %c0_41, %c0_42], %119 {strides = array<i32>} : memref<1x8x32xbf16, #tpu.memory_space<vmem>>, vector<1x8x32xbf16>,
    return
  }
  func.func @transform_0(%arg0: i32) -> (i32, i32, i32) {
    %c0_i32 = arith.constant 0 : i32
    %c0_i32_0 = arith.constant 0 : i32
    %c0_i32_1 = arith.constant 0 : i32
    return %arg0, %c0_i32, %c0_i32_0 : i32, i32, i32
  }
  func.func @transform_1(%arg0: i32) -> (i32, i32, i32) {
    %c0_i32 = arith.constant 0 : i32
    %c0_i32_0 = arith.constant 0 : i32
    %c0_i32_1 = arith.constant 0 : i32
    %c0_i32_2 = arith.constant 0 : i32
    return %c0_i32, %c0_i32_0, %c0_i32_1 : i32, i32, i32
  }
  func.func @transform_2(%arg0: i32) -> (i32, i32) {
    %c0_i32 = arith.constant 0 : i32
    %c0_i32_0 = arith.constant 0 : i32
    %c0_i32_1 = arith.constant 0 : i32
    return %c0_i32, %c0_i32_0 : i32, i32
  }
  func.func @transform_3(%arg0: i32) -> (i32, i32) {
    %c0_i32 = arith.constant 0 : i32
    %c0_i32_0 = arith.constant 0 : i32
    %c0_i32_1 = arith.constant 0 : i32
    return %c0_i32, %c0_i32_0 : i32, i32
  }
  func.func @transform_4(%arg0: i32) -> (i32, i32) {
    %c0_i32 = arith.constant 0 : i32
    %c0_i32_0 = arith.constant 0 : i32
    %c0_i32_1 = arith.constant 0 : i32
    return %c0_i32, %c0_i32_0 : i32, i32
  }
  func.func @transform_5(%arg0: i32) -> (i32, i32) {
    %c0_i32 = arith.constant 0 : i32
    %c0_i32_0 = arith.constant 0 : i32
    %c0_i32_1 = arith.constant 0 : i32
    return %c0_i32, %c0_i32_0 : i32, i32
  }
  func.func @transform_6(%arg0: i32) -> (i32, i32) {
    %c0_i32 = arith.constant 0 : i32
    %c0_i32_0 = arith.constant 0 : i32
    %c0_i32_1 = arith.constant 0 : i32
    return %c0_i32, %c0_i32_0 : i32, i32
  }
  func.func @transform_7(%arg0: i32) -> (i32, i32) {
    %c0_i32 = arith.constant 0 : i32
    %c0_i32_0 = arith.constant 0 : i32
    %c0_i32_1 = arith.constant 0 : i32
    return %c0_i32, %c0_i32_0 : i32, i32
  }
  func.func @transform_8(%arg0: i32) -> (i32, i32, i32) {
    %c0_i32 = arith.constant 0 : i32
    %c0_i32_0 = arith.constant 0 : i32
    %c0_i32_1 = arith.constant 0 : i32
    return %arg0, %c0_i32, %c0_i32_0 : i32, i32, i32
  }
}

module attributes {stable_mosaic.version = 11 : i64} {
  func.func @_cross_mha_addln_kernel(%arg0: i32, %arg1: i32, %arg2: memref<1x8x32xbf16, #tpu.memory_space<vmem>>, %arg3: memref<1x8x32xbf16, #tpu.memory_space<vmem>>, %arg4: memref<32x32xbf16, #tpu.memory_space<vmem>>, %arg5: memref<1x32xf32, #tpu.memory_space<vmem>>, %arg6: memref<32x64xbf16, #tpu.memory_space<vmem>>, %arg7: memref<1x64xf32, #tpu.memory_space<vmem>>, %arg8: memref<32x32xbf16, #tpu.memory_space<vmem>>, %arg9: memref<1x32xf32, #tpu.memory_space<vmem>>, %arg10: memref<1x32xf32, #tpu.memory_space<vmem>>, %arg11: memref<1x32xf32, #tpu.memory_space<vmem>>, %arg12: memref<1x8x32xbf16, #tpu.memory_space<vmem>>) attributes {dimension_semantics = [#tpu.dimension_semantics<parallel>, #tpu.dimension_semantics<parallel>], iteration_bounds = array<i64: 2, 1>, scalar_prefetch = 0 : i64, scratch_operands = 0 : i64, tpu.core_type = #tpu.core_type<tc>, window_params = [{transform_indices = @transform_0, window_bounds = array<i64: 1, 8, 32>}, {transform_indices = @transform_1, window_bounds = array<i64: 1, 8, 32>}, {pipeline_mode = #tpu.pipeline_mode<synchronous>, transform_indices = @transform_2, window_bounds = array<i64: 32, 32>}, {pipeline_mode = #tpu.pipeline_mode<synchronous>, transform_indices = @transform_3, window_bounds = array<i64: 1, 32>}, {pipeline_mode = #tpu.pipeline_mode<synchronous>, transform_indices = @transform_4, window_bounds = array<i64: 32, 64>}, {pipeline_mode = #tpu.pipeline_mode<synchronous>, transform_indices = @transform_5, window_bounds = array<i64: 1, 64>}, {pipeline_mode = #tpu.pipeline_mode<synchronous>, transform_indices = @transform_6, window_bounds = array<i64: 32, 32>}, {pipeline_mode = #tpu.pipeline_mode<synchronous>, transform_indices = @transform_7, window_bounds = array<i64: 1, 32>}, {pipeline_mode = #tpu.pipeline_mode<synchronous>, transform_indices = @transform_8, window_bounds = array<i64: 1, 32>}, {pipeline_mode = #tpu.pipeline_mode<synchronous>, transform_indices = @transform_9, window_bounds = array<i64: 1, 32>}, {transform_indices = @transform_10, window_bounds = array<i64: 1, 8, 32>}]} {
    %c0 = arith.constant 0 : index
    %c0_0 = arith.constant 0 : index
    %c0_1 = arith.constant 0 : index
    %0 = vector.load %arg2[%c0, %c0_0, %c0_1] : memref<1x8x32xbf16, #tpu.memory_space<vmem>>, vector<1x8x32xbf16>
    %1 = vector.shape_cast %0 : vector<1x8x32xbf16> to vector<8x32xbf16>
    %c0_2 = arith.constant 0 : index
    %c0_3 = arith.constant 0 : index
    %c0_4 = arith.constant 0 : index
    %2 = vector.load %arg3[%c0_2, %c0_3, %c0_4] : memref<1x8x32xbf16, #tpu.memory_space<vmem>>, vector<1x8x32xbf16>
    %3 = vector.shape_cast %2 : vector<1x8x32xbf16> to vector<8x32xbf16>
    %c0_5 = arith.constant 0 : index
    %c0_6 = arith.constant 0 : index
    %4 = vector.load %arg4[%c0_5, %c0_6] : memref<32x32xbf16, #tpu.memory_space<vmem>>, vector<32x32xbf16>
    %cst = arith.constant dense<0.000000e+00> : vector<8x32xf32>
    %5 = tpu.matmul %1, %4, %cst {dimension_numbers = #tpu.dot_dimension_numbers<[1], [0], [0], [1], [0, 0, 1, 1], [], []>} : vector<8x32xbf16>, vector<32x32xbf16>, vector<8x32xf32> -> vector<8x32xf32>
    %c0_7 = arith.constant 0 : index
    %c0_8 = arith.constant 0 : index
    %6 = vector.load %arg5[%c0_7, %c0_8] : memref<1x32xf32, #tpu.memory_space<vmem>>, vector<1x32xf32>
    %7 = vector.broadcast %6 : vector<1x32xf32> to vector<8x32xf32>
    %8 = arith.addf %5, %7 : vector<8x32xf32>
    %9 = arith.truncf %8 : vector<8x32xf32> to vector<8x32xbf16>
    %c0_9 = arith.constant 0 : index
    %c0_10 = arith.constant 0 : index
    %10 = vector.load %arg6[%c0_9, %c0_10] : memref<32x64xbf16, #tpu.memory_space<vmem>>, vector<32x64xbf16>
    %cst_11 = arith.constant dense<0.000000e+00> : vector<8x64xf32>
    %11 = tpu.matmul %3, %10, %cst_11 {dimension_numbers = #tpu.dot_dimension_numbers<[1], [0], [0], [1], [0, 0, 1, 1], [], []>} : vector<8x32xbf16>, vector<32x64xbf16>, vector<8x64xf32> -> vector<8x64xf32>
    %c0_12 = arith.constant 0 : index
    %c0_13 = arith.constant 0 : index
    %12 = vector.load %arg7[%c0_12, %c0_13] : memref<1x64xf32, #tpu.memory_space<vmem>>, vector<1x64xf32>
    %13 = vector.broadcast %12 : vector<1x64xf32> to vector<8x64xf32>
    %14 = arith.addf %11, %13 : vector<8x64xf32>
    %15 = arith.truncf %14 : vector<8x64xf32> to vector<8x64xbf16>
    %16 = vector.extract_strided_slice %15 {offsets = [0, 0], sizes = [8, 32], strides = [1, 1]} : vector<8x64xbf16> to vector<8x32xbf16>
    %17 = vector.extract_strided_slice %15 {offsets = [0, 32], sizes = [8, 32], strides = [1, 1]} : vector<8x64xbf16> to vector<8x32xbf16>
    %18 = vector.extract_strided_slice %9 {offsets = [0, 0], sizes = [8, 8], strides = [1, 1]} : vector<8x32xbf16> to vector<8x8xbf16>
    %19 = vector.extract_strided_slice %16 {offsets = [0, 0], sizes = [8, 8], strides = [1, 1]} : vector<8x32xbf16> to vector<8x8xbf16>
    %cst_14 = arith.constant dense<0.000000e+00> : vector<8x8xf32>
    %20 = tpu.matmul %18, %19, %cst_14 {dimension_numbers = #tpu.dot_dimension_numbers<[1], [1], [0], [0], [0, 0, 1, 0], [], []>} : vector<8x8xbf16>, vector<8x8xbf16>, vector<8x8xf32> -> vector<8x8xf32>
    %cst_15 = arith.constant dense<0xFF800000> : vector<8xf32>
    %21 = vector.multi_reduction <maximumf>, %20, %cst_15 [1] : vector<8x8xf32> to vector<8xf32>
    %22 = vector.shape_cast %21 : vector<8xf32> to vector<8x1xf32>
    %23 = vector.broadcast %22 : vector<8x1xf32> to vector<8x8xf32>
    %24 = arith.subf %20, %23 : vector<8x8xf32>
    %25 = math.exp %24 : vector<8x8xf32>
    %cst_16 = arith.constant dense<0.000000e+00> : vector<8xf32>
    %26 = vector.multi_reduction <add>, %25, %cst_16 [1] : vector<8x8xf32> to vector<8xf32>
    %27 = vector.shape_cast %26 : vector<8xf32> to vector<8x1xf32>
    %28 = tpu.reciprocal %27 {approx = true} : vector<8x1xf32> -> vector<8x1xf32>
    %29 = vector.broadcast %28 : vector<8x1xf32> to vector<8x8xf32>
    %30 = arith.mulf %25, %29 : vector<8x8xf32>
    %31 = arith.truncf %30 : vector<8x8xf32> to vector<8x8xbf16>
    %32 = vector.extract_strided_slice %17 {offsets = [0, 0], sizes = [8, 8], strides = [1, 1]} : vector<8x32xbf16> to vector<8x8xbf16>
    %cst_17 = arith.constant dense<0.000000e+00> : vector<8x8xf32>
    %33 = tpu.matmul %31, %32, %cst_17 {dimension_numbers = #tpu.dot_dimension_numbers<[1], [0], [0], [1], [0, 0, 1, 1], [], []>} : vector<8x8xbf16>, vector<8x8xbf16>, vector<8x8xf32> -> vector<8x8xf32>
    %34 = vector.extract_strided_slice %9 {offsets = [0, 8], sizes = [8, 8], strides = [1, 1]} : vector<8x32xbf16> to vector<8x8xbf16>
    %35 = vector.extract_strided_slice %16 {offsets = [0, 8], sizes = [8, 8], strides = [1, 1]} : vector<8x32xbf16> to vector<8x8xbf16>
    %cst_18 = arith.constant dense<0.000000e+00> : vector<8x8xf32>
    %36 = tpu.matmul %34, %35, %cst_18 {dimension_numbers = #tpu.dot_dimension_numbers<[1], [1], [0], [0], [0, 0, 1, 0], [], []>} : vector<8x8xbf16>, vector<8x8xbf16>, vector<8x8xf32> -> vector<8x8xf32>
    %cst_19 = arith.constant dense<0xFF800000> : vector<8xf32>
    %37 = vector.multi_reduction <maximumf>, %36, %cst_19 [1] : vector<8x8xf32> to vector<8xf32>
    %38 = vector.shape_cast %37 : vector<8xf32> to vector<8x1xf32>
    %39 = vector.broadcast %38 : vector<8x1xf32> to vector<8x8xf32>
    %40 = arith.subf %36, %39 : vector<8x8xf32>
    %41 = math.exp %40 : vector<8x8xf32>
    %cst_20 = arith.constant dense<0.000000e+00> : vector<8xf32>
    %42 = vector.multi_reduction <add>, %41, %cst_20 [1] : vector<8x8xf32> to vector<8xf32>
    %43 = vector.shape_cast %42 : vector<8xf32> to vector<8x1xf32>
    %44 = tpu.reciprocal %43 {approx = true} : vector<8x1xf32> -> vector<8x1xf32>
    %45 = vector.broadcast %44 : vector<8x1xf32> to vector<8x8xf32>
    %46 = arith.mulf %41, %45 : vector<8x8xf32>
    %47 = arith.truncf %46 : vector<8x8xf32> to vector<8x8xbf16>
    %48 = vector.extract_strided_slice %17 {offsets = [0, 8], sizes = [8, 8], strides = [1, 1]} : vector<8x32xbf16> to vector<8x8xbf16>
    %cst_21 = arith.constant dense<0.000000e+00> : vector<8x8xf32>
    %49 = tpu.matmul %47, %48, %cst_21 {dimension_numbers = #tpu.dot_dimension_numbers<[1], [0], [0], [1], [0, 0, 1, 1], [], []>} : vector<8x8xbf16>, vector<8x8xbf16>, vector<8x8xf32> -> vector<8x8xf32>
    %50 = vector.extract_strided_slice %9 {offsets = [0, 16], sizes = [8, 8], strides = [1, 1]} : vector<8x32xbf16> to vector<8x8xbf16>
    %51 = vector.extract_strided_slice %16 {offsets = [0, 16], sizes = [8, 8], strides = [1, 1]} : vector<8x32xbf16> to vector<8x8xbf16>
    %cst_22 = arith.constant dense<0.000000e+00> : vector<8x8xf32>
    %52 = tpu.matmul %50, %51, %cst_22 {dimension_numbers = #tpu.dot_dimension_numbers<[1], [1], [0], [0], [0, 0, 1, 0], [], []>} : vector<8x8xbf16>, vector<8x8xbf16>, vector<8x8xf32> -> vector<8x8xf32>
    %cst_23 = arith.constant dense<0xFF800000> : vector<8xf32>
    %53 = vector.multi_reduction <maximumf>, %52, %cst_23 [1] : vector<8x8xf32> to vector<8xf32>
    %54 = vector.shape_cast %53 : vector<8xf32> to vector<8x1xf32>
    %55 = vector.broadcast %54 : vector<8x1xf32> to vector<8x8xf32>
    %56 = arith.subf %52, %55 : vector<8x8xf32>
    %57 = math.exp %56 : vector<8x8xf32>
    %cst_24 = arith.constant dense<0.000000e+00> : vector<8xf32>
    %58 = vector.multi_reduction <add>, %57, %cst_24 [1] : vector<8x8xf32> to vector<8xf32>
    %59 = vector.shape_cast %58 : vector<8xf32> to vector<8x1xf32>
    %60 = tpu.reciprocal %59 {approx = true} : vector<8x1xf32> -> vector<8x1xf32>
    %61 = vector.broadcast %60 : vector<8x1xf32> to vector<8x8xf32>
    %62 = arith.mulf %57, %61 : vector<8x8xf32>
    %63 = arith.truncf %62 : vector<8x8xf32> to vector<8x8xbf16>
    %64 = vector.extract_strided_slice %17 {offsets = [0, 16], sizes = [8, 8], strides = [1, 1]} : vector<8x32xbf16> to vector<8x8xbf16>
    %cst_25 = arith.constant dense<0.000000e+00> : vector<8x8xf32>
    %65 = tpu.matmul %63, %64, %cst_25 {dimension_numbers = #tpu.dot_dimension_numbers<[1], [0], [0], [1], [0, 0, 1, 1], [], []>} : vector<8x8xbf16>, vector<8x8xbf16>, vector<8x8xf32> -> vector<8x8xf32>
    %66 = vector.extract_strided_slice %9 {offsets = [0, 24], sizes = [8, 8], strides = [1, 1]} : vector<8x32xbf16> to vector<8x8xbf16>
    %67 = vector.extract_strided_slice %16 {offsets = [0, 24], sizes = [8, 8], strides = [1, 1]} : vector<8x32xbf16> to vector<8x8xbf16>
    %cst_26 = arith.constant dense<0.000000e+00> : vector<8x8xf32>
    %68 = tpu.matmul %66, %67, %cst_26 {dimension_numbers = #tpu.dot_dimension_numbers<[1], [1], [0], [0], [0, 0, 1, 0], [], []>} : vector<8x8xbf16>, vector<8x8xbf16>, vector<8x8xf32> -> vector<8x8xf32>
    %cst_27 = arith.constant dense<0xFF800000> : vector<8xf32>
    %69 = vector.multi_reduction <maximumf>, %68, %cst_27 [1] : vector<8x8xf32> to vector<8xf32>
    %70 = vector.shape_cast %69 : vector<8xf32> to vector<8x1xf32>
    %71 = vector.broadcast %70 : vector<8x1xf32> to vector<8x8xf32>
    %72 = arith.subf %68, %71 : vector<8x8xf32>
    %73 = math.exp %72 : vector<8x8xf32>
    %cst_28 = arith.constant dense<0.000000e+00> : vector<8xf32>
    %74 = vector.multi_reduction <add>, %73, %cst_28 [1] : vector<8x8xf32> to vector<8xf32>
    %75 = vector.shape_cast %74 : vector<8xf32> to vector<8x1xf32>
    %76 = tpu.reciprocal %75 {approx = true} : vector<8x1xf32> -> vector<8x1xf32>
    %77 = vector.broadcast %76 : vector<8x1xf32> to vector<8x8xf32>
    %78 = arith.mulf %73, %77 : vector<8x8xf32>
    %79 = arith.truncf %78 : vector<8x8xf32> to vector<8x8xbf16>
    %80 = vector.extract_strided_slice %17 {offsets = [0, 24], sizes = [8, 8], strides = [1, 1]} : vector<8x32xbf16> to vector<8x8xbf16>
    %cst_29 = arith.constant dense<0.000000e+00> : vector<8x8xf32>
    %81 = tpu.matmul %79, %80, %cst_29 {dimension_numbers = #tpu.dot_dimension_numbers<[1], [0], [0], [1], [0, 0, 1, 1], [], []>} : vector<8x8xbf16>, vector<8x8xbf16>, vector<8x8xf32> -> vector<8x8xf32>
    %82 = tpu.concatenate %33, %49, %65, %81 in 1 : vector<8x8xf32>, vector<8x8xf32>, vector<8x8xf32>, vector<8x8xf32> -> vector<8x32xf32>
    %83 = arith.truncf %82 : vector<8x32xf32> to vector<8x32xbf16>
    %c0_30 = arith.constant 0 : index
    %c0_31 = arith.constant 0 : index
    %84 = vector.load %arg8[%c0_30, %c0_31] : memref<32x32xbf16, #tpu.memory_space<vmem>>, vector<32x32xbf16>
    %cst_32 = arith.constant dense<0.000000e+00> : vector<8x32xf32>
    %85 = tpu.matmul %83, %84, %cst_32 {dimension_numbers = #tpu.dot_dimension_numbers<[1], [0], [0], [1], [0, 0, 1, 1], [], []>} : vector<8x32xbf16>, vector<32x32xbf16>, vector<8x32xf32> -> vector<8x32xf32>
    %c0_33 = arith.constant 0 : index
    %c0_34 = arith.constant 0 : index
    %86 = vector.load %arg9[%c0_33, %c0_34] : memref<1x32xf32, #tpu.memory_space<vmem>>, vector<1x32xf32>
    %87 = vector.broadcast %86 : vector<1x32xf32> to vector<8x32xf32>
    %88 = arith.addf %85, %87 : vector<8x32xf32>
    %89 = arith.extf %1 : vector<8x32xbf16> to vector<8x32xf32>
    %90 = arith.addf %89, %88 : vector<8x32xf32>
    %c0_35 = arith.constant 0 : index
    %c0_36 = arith.constant 0 : index
    %91 = vector.load %arg10[%c0_35, %c0_36] : memref<1x32xf32, #tpu.memory_space<vmem>>, vector<1x32xf32>
    %c0_37 = arith.constant 0 : index
    %c0_38 = arith.constant 0 : index
    %92 = vector.load %arg11[%c0_37, %c0_38] : memref<1x32xf32, #tpu.memory_space<vmem>>, vector<1x32xf32>
    %cst_39 = arith.constant dense<0.000000e+00> : vector<8xf32>
    %93 = vector.multi_reduction <add>, %90, %cst_39 [1] : vector<8x32xf32> to vector<8xf32>
    %94 = vector.shape_cast %93 : vector<8xf32> to vector<8x1xf32>
    %cst_40 = arith.constant 3.200000e+01 : f32
    %95 = vector.broadcast %cst_40 : f32 to vector<8x1xf32>
    %96 = arith.divf %94, %95 : vector<8x1xf32>
    %97 = arith.mulf %90, %90 : vector<8x32xf32>
    %cst_41 = arith.constant dense<0.000000e+00> : vector<8xf32>
    %98 = vector.multi_reduction <add>, %97, %cst_41 [1] : vector<8x32xf32> to vector<8xf32>
    %99 = vector.shape_cast %98 : vector<8xf32> to vector<8x1xf32>
    %cst_42 = arith.constant 3.200000e+01 : f32
    %100 = vector.broadcast %cst_42 : f32 to vector<8x1xf32>
    %101 = arith.divf %99, %100 : vector<8x1xf32>
    %102 = arith.mulf %96, %96 : vector<8x1xf32>
    %103 = arith.subf %101, %102 : vector<8x1xf32>
    %cst_43 = arith.constant 0.000000e+00 : f32
    %104 = vector.broadcast %cst_43 : f32 to vector<8x1xf32>
    %105 = arith.maximumf %103, %104 : vector<8x1xf32>
    %106 = vector.broadcast %96 : vector<8x1xf32> to vector<8x32xf32>
    %107 = arith.subf %90, %106 : vector<8x32xf32>
    %cst_44 = arith.constant 9.99999974E-6 : f32
    %108 = vector.broadcast %cst_44 : f32 to vector<8x1xf32>
    %109 = arith.addf %105, %108 : vector<8x1xf32>
    %110 = math.rsqrt %109 : vector<8x1xf32>
    %111 = vector.broadcast %110 : vector<8x1xf32> to vector<8x32xf32>
    %112 = arith.mulf %107, %111 : vector<8x32xf32>
    %113 = vector.broadcast %91 : vector<1x32xf32> to vector<8x32xf32>
    %114 = arith.mulf %112, %113 : vector<8x32xf32>
    %115 = vector.broadcast %92 : vector<1x32xf32> to vector<8x32xf32>
    %116 = arith.addf %114, %115 : vector<8x32xf32>
    %117 = arith.truncf %116 : vector<8x32xf32> to vector<8x32xbf16>
    %c0_45 = arith.constant 0 : index
    %c0_46 = arith.constant 0 : index
    %c0_47 = arith.constant 0 : index
    %118 = vector.load %arg12[%c0_45, %c0_46, %c0_47] : memref<1x8x32xbf16, #tpu.memory_space<vmem>>, vector<1x8x32xbf16>
    %119 = vector.shape_cast %118 : vector<1x8x32xbf16> to vector<8x32xbf16>
    %120 = vector.shape_cast %117 : vector<8x32xbf16> to vector<1x8x32xbf16>
    tpu.vector_store %arg12[%c0_45, %c0_46, %c0_47], %120 {strides = array<i32>} : memref<1x8x32xbf16, #tpu.memory_space<vmem>>, vector<1x8x32xbf16>,
    return
  }
  func.func @transform_0(%arg0: i32, %arg1: i32) -> (i32, i32, i32) {
    %c0_i32 = arith.constant 0 : i32
    %c0_i32_0 = arith.constant 0 : i32
    return %arg0, %arg1, %c0_i32 : i32, i32, i32
  }
  func.func @transform_1(%arg0: i32, %arg1: i32) -> (i32, i32, i32) {
    %c0_i32 = arith.constant 0 : i32
    %c0_i32_0 = arith.constant 0 : i32
    %c0_i32_1 = arith.constant 0 : i32
    return %arg0, %c0_i32, %c0_i32_0 : i32, i32, i32
  }
  func.func @transform_2(%arg0: i32, %arg1: i32) -> (i32, i32) {
    %c0_i32 = arith.constant 0 : i32
    %c0_i32_0 = arith.constant 0 : i32
    %c0_i32_1 = arith.constant 0 : i32
    return %c0_i32, %c0_i32_0 : i32, i32
  }
  func.func @transform_3(%arg0: i32, %arg1: i32) -> (i32, i32) {
    %c0_i32 = arith.constant 0 : i32
    %c0_i32_0 = arith.constant 0 : i32
    %c0_i32_1 = arith.constant 0 : i32
    return %c0_i32, %c0_i32_0 : i32, i32
  }
  func.func @transform_4(%arg0: i32, %arg1: i32) -> (i32, i32) {
    %c0_i32 = arith.constant 0 : i32
    %c0_i32_0 = arith.constant 0 : i32
    %c0_i32_1 = arith.constant 0 : i32
    return %c0_i32, %c0_i32_0 : i32, i32
  }
  func.func @transform_5(%arg0: i32, %arg1: i32) -> (i32, i32) {
    %c0_i32 = arith.constant 0 : i32
    %c0_i32_0 = arith.constant 0 : i32
    %c0_i32_1 = arith.constant 0 : i32
    return %c0_i32, %c0_i32_0 : i32, i32
  }
  func.func @transform_6(%arg0: i32, %arg1: i32) -> (i32, i32) {
    %c0_i32 = arith.constant 0 : i32
    %c0_i32_0 = arith.constant 0 : i32
    %c0_i32_1 = arith.constant 0 : i32
    return %c0_i32, %c0_i32_0 : i32, i32
  }
  func.func @transform_7(%arg0: i32, %arg1: i32) -> (i32, i32) {
    %c0_i32 = arith.constant 0 : i32
    %c0_i32_0 = arith.constant 0 : i32
    %c0_i32_1 = arith.constant 0 : i32
    return %c0_i32, %c0_i32_0 : i32, i32
  }
  func.func @transform_8(%arg0: i32, %arg1: i32) -> (i32, i32) {
    %c0_i32 = arith.constant 0 : i32
    %c0_i32_0 = arith.constant 0 : i32
    %c0_i32_1 = arith.constant 0 : i32
    return %c0_i32, %c0_i32_0 : i32, i32
  }
  func.func @transform_9(%arg0: i32, %arg1: i32) -> (i32, i32) {
    %c0_i32 = arith.constant 0 : i32
    %c0_i32_0 = arith.constant 0 : i32
    %c0_i32_1 = arith.constant 0 : i32
    return %c0_i32, %c0_i32_0 : i32, i32
  }
  func.func @transform_10(%arg0: i32, %arg1: i32) -> (i32, i32, i32) {
    %c0_i32 = arith.constant 0 : i32
    %c0_i32_0 = arith.constant 0 : i32
    return %arg0, %arg1, %c0_i32 : i32, i32, i32
  }
}

module attributes {stable_mosaic.version = 11 : i64} {
  func.func @_ffn_addln_kernel(%arg0: i32, %arg1: memref<16x32xbf16, #tpu.memory_space<vmem>>, %arg2: memref<32x64xbf16, #tpu.memory_space<vmem>>, %arg3: memref<1x64xf32, #tpu.memory_space<vmem>>, %arg4: memref<64x32xbf16, #tpu.memory_space<vmem>>, %arg5: memref<1x32xf32, #tpu.memory_space<vmem>>, %arg6: memref<1x32xf32, #tpu.memory_space<vmem>>, %arg7: memref<1x32xf32, #tpu.memory_space<vmem>>, %arg8: memref<16x32xbf16, #tpu.memory_space<vmem>>) attributes {dimension_semantics = [#tpu.dimension_semantics<parallel>], iteration_bounds = array<i64: 1>, scalar_prefetch = 0 : i64, scratch_operands = 0 : i64, tpu.core_type = #tpu.core_type<tc>, window_params = [{transform_indices = @transform_0, window_bounds = array<i64: 16, 32>}, {pipeline_mode = #tpu.pipeline_mode<synchronous>, transform_indices = @transform_1, window_bounds = array<i64: 32, 64>}, {pipeline_mode = #tpu.pipeline_mode<synchronous>, transform_indices = @transform_2, window_bounds = array<i64: 1, 64>}, {pipeline_mode = #tpu.pipeline_mode<synchronous>, transform_indices = @transform_3, window_bounds = array<i64: 64, 32>}, {pipeline_mode = #tpu.pipeline_mode<synchronous>, transform_indices = @transform_4, window_bounds = array<i64: 1, 32>}, {pipeline_mode = #tpu.pipeline_mode<synchronous>, transform_indices = @transform_5, window_bounds = array<i64: 1, 32>}, {pipeline_mode = #tpu.pipeline_mode<synchronous>, transform_indices = @transform_6, window_bounds = array<i64: 1, 32>}, {transform_indices = @transform_7, window_bounds = array<i64: 16, 32>}]} {
    %c0 = arith.constant 0 : index
    %c0_0 = arith.constant 0 : index
    %0 = vector.load %arg1[%c0, %c0_0] : memref<16x32xbf16, #tpu.memory_space<vmem>>, vector<16x32xbf16>
    %c0_1 = arith.constant 0 : index
    %c0_2 = arith.constant 0 : index
    %1 = vector.load %arg2[%c0_1, %c0_2] : memref<32x64xbf16, #tpu.memory_space<vmem>>, vector<32x64xbf16>
    %cst = arith.constant dense<0.000000e+00> : vector<16x64xf32>
    %2 = tpu.matmul %0, %1, %cst {dimension_numbers = #tpu.dot_dimension_numbers<[1], [0], [0], [1], [0, 0, 1, 1], [], []>} : vector<16x32xbf16>, vector<32x64xbf16>, vector<16x64xf32> -> vector<16x64xf32>
    %c0_3 = arith.constant 0 : index
    %c0_4 = arith.constant 0 : index
    %3 = vector.load %arg3[%c0_3, %c0_4] : memref<1x64xf32, #tpu.memory_space<vmem>>, vector<1x64xf32>
    %4 = vector.broadcast %3 : vector<1x64xf32> to vector<16x64xf32>
    %5 = arith.addf %2, %4 : vector<16x64xf32>
    %cst_5 = arith.constant 0.000000e+00 : f32
    %6 = vector.broadcast %cst_5 : f32 to vector<16x64xf32>
    %7 = arith.maximumf %5, %6 : vector<16x64xf32>
    %8 = arith.truncf %7 : vector<16x64xf32> to vector<16x64xbf16>
    %9 = arith.extf %0 : vector<16x32xbf16> to vector<16x32xf32>
    %c0_6 = arith.constant 0 : index
    %c0_7 = arith.constant 0 : index
    %10 = vector.load %arg4[%c0_6, %c0_7] : memref<64x32xbf16, #tpu.memory_space<vmem>>, vector<64x32xbf16>
    %cst_8 = arith.constant dense<0.000000e+00> : vector<16x32xf32>
    %11 = tpu.matmul %8, %10, %cst_8 {dimension_numbers = #tpu.dot_dimension_numbers<[1], [0], [0], [1], [0, 0, 1, 1], [], []>} : vector<16x64xbf16>, vector<64x32xbf16>, vector<16x32xf32> -> vector<16x32xf32>
    %12 = arith.addf %9, %11 : vector<16x32xf32>
    %c0_9 = arith.constant 0 : index
    %c0_10 = arith.constant 0 : index
    %13 = vector.load %arg5[%c0_9, %c0_10] : memref<1x32xf32, #tpu.memory_space<vmem>>, vector<1x32xf32>
    %14 = vector.broadcast %13 : vector<1x32xf32> to vector<16x32xf32>
    %15 = arith.addf %12, %14 : vector<16x32xf32>
    %c0_11 = arith.constant 0 : index
    %c0_12 = arith.constant 0 : index
    %16 = vector.load %arg6[%c0_11, %c0_12] : memref<1x32xf32, #tpu.memory_space<vmem>>, vector<1x32xf32>
    %c0_13 = arith.constant 0 : index
    %c0_14 = arith.constant 0 : index
    %17 = vector.load %arg7[%c0_13, %c0_14] : memref<1x32xf32, #tpu.memory_space<vmem>>, vector<1x32xf32>
    %cst_15 = arith.constant dense<0.000000e+00> : vector<16xf32>
    %18 = vector.multi_reduction <add>, %15, %cst_15 [1] : vector<16x32xf32> to vector<16xf32>
    %19 = vector.shape_cast %18 : vector<16xf32> to vector<16x1xf32>
    %cst_16 = arith.constant 3.200000e+01 : f32
    %20 = vector.broadcast %cst_16 : f32 to vector<16x1xf32>
    %21 = arith.divf %19, %20 : vector<16x1xf32>
    %22 = arith.mulf %15, %15 : vector<16x32xf32>
    %cst_17 = arith.constant dense<0.000000e+00> : vector<16xf32>
    %23 = vector.multi_reduction <add>, %22, %cst_17 [1] : vector<16x32xf32> to vector<16xf32>
    %24 = vector.shape_cast %23 : vector<16xf32> to vector<16x1xf32>
    %cst_18 = arith.constant 3.200000e+01 : f32
    %25 = vector.broadcast %cst_18 : f32 to vector<16x1xf32>
    %26 = arith.divf %24, %25 : vector<16x1xf32>
    %27 = arith.mulf %21, %21 : vector<16x1xf32>
    %28 = arith.subf %26, %27 : vector<16x1xf32>
    %cst_19 = arith.constant 0.000000e+00 : f32
    %29 = vector.broadcast %cst_19 : f32 to vector<16x1xf32>
    %30 = arith.maximumf %28, %29 : vector<16x1xf32>
    %31 = vector.broadcast %21 : vector<16x1xf32> to vector<16x32xf32>
    %32 = arith.subf %15, %31 : vector<16x32xf32>
    %cst_20 = arith.constant 9.99999974E-6 : f32
    %33 = vector.broadcast %cst_20 : f32 to vector<16x1xf32>
    %34 = arith.addf %30, %33 : vector<16x1xf32>
    %35 = math.rsqrt %34 : vector<16x1xf32>
    %36 = vector.broadcast %35 : vector<16x1xf32> to vector<16x32xf32>
    %37 = arith.mulf %32, %36 : vector<16x32xf32>
    %38 = vector.broadcast %16 : vector<1x32xf32> to vector<16x32xf32>
    %39 = arith.mulf %37, %38 : vector<16x32xf32>
    %40 = vector.broadcast %17 : vector<1x32xf32> to vector<16x32xf32>
    %41 = arith.addf %39, %40 : vector<16x32xf32>
    %42 = arith.truncf %41 : vector<16x32xf32> to vector<16x32xbf16>
    %c0_21 = arith.constant 0 : index
    %c0_22 = arith.constant 0 : index
    %43 = vector.load %arg8[%c0_21, %c0_22] : memref<16x32xbf16, #tpu.memory_space<vmem>>, vector<16x32xbf16>
    tpu.vector_store %arg8[%c0_21, %c0_22], %42 {strides = array<i32>} : memref<16x32xbf16, #tpu.memory_space<vmem>>, vector<16x32xbf16>,
    return
  }
  func.func @transform_0(%arg0: i32) -> (i32, i32) {
    %c0_i32 = arith.constant 0 : i32
    %c0_i32_0 = arith.constant 0 : i32
    return %arg0, %c0_i32 : i32, i32
  }
  func.func @transform_1(%arg0: i32) -> (i32, i32) {
    %c0_i32 = arith.constant 0 : i32
    %c0_i32_0 = arith.constant 0 : i32
    %c0_i32_1 = arith.constant 0 : i32
    return %c0_i32, %c0_i32_0 : i32, i32
  }
  func.func @transform_2(%arg0: i32) -> (i32, i32) {
    %c0_i32 = arith.constant 0 : i32
    %c0_i32_0 = arith.constant 0 : i32
    %c0_i32_1 = arith.constant 0 : i32
    return %c0_i32, %c0_i32_0 : i32, i32
  }
  func.func @transform_3(%arg0: i32) -> (i32, i32) {
    %c0_i32 = arith.constant 0 : i32
    %c0_i32_0 = arith.constant 0 : i32
    %c0_i32_1 = arith.constant 0 : i32
    return %c0_i32, %c0_i32_0 : i32, i32
  }
  func.func @transform_4(%arg0: i32) -> (i32, i32) {
    %c0_i32 = arith.constant 0 : i32
    %c0_i32_0 = arith.constant 0 : i32
    %c0_i32_1 = arith.constant 0 : i32
    return %c0_i32, %c0_i32_0 : i32, i32
  }
  func.func @transform_5(%arg0: i32) -> (i32, i32) {
    %c0_i32 = arith.constant 0 : i32
    %c0_i32_0 = arith.constant 0 : i32
    %c0_i32_1 = arith.constant 0 : i32
    return %c0_i32, %c0_i32_0 : i32, i32
  }
  func.func @transform_6(%arg0: i32) -> (i32, i32) {
    %c0_i32 = arith.constant 0 : i32
    %c0_i32_0 = arith.constant 0 : i32
    %c0_i32_1 = arith.constant 0 : i32
    return %c0_i32, %c0_i32_0 : i32, i32
  }
  func.func @transform_7(%arg0: i32) -> (i32, i32) {
    %c0_i32 = arith.constant 0 : i32
    %c0_i32_0 = arith.constant 0 : i32
    return %arg0, %c0_i32 : i32, i32
  }
}

module attributes {stable_mosaic.version = 11 : i64} {
  func.func @_ffn_addln_kernel(%arg0: i32, %arg1: memref<16x32xbf16, #tpu.memory_space<vmem>>, %arg2: memref<32x64xbf16, #tpu.memory_space<vmem>>, %arg3: memref<1x64xf32, #tpu.memory_space<vmem>>, %arg4: memref<64x32xbf16, #tpu.memory_space<vmem>>, %arg5: memref<1x32xf32, #tpu.memory_space<vmem>>, %arg6: memref<1x32xf32, #tpu.memory_space<vmem>>, %arg7: memref<1x32xf32, #tpu.memory_space<vmem>>, %arg8: memref<16x32xf32, #tpu.memory_space<vmem>>) attributes {dimension_semantics = [#tpu.dimension_semantics<parallel>], iteration_bounds = array<i64: 1>, scalar_prefetch = 0 : i64, scratch_operands = 0 : i64, tpu.core_type = #tpu.core_type<tc>, window_params = [{transform_indices = @transform_0, window_bounds = array<i64: 16, 32>}, {pipeline_mode = #tpu.pipeline_mode<synchronous>, transform_indices = @transform_1, window_bounds = array<i64: 32, 64>}, {pipeline_mode = #tpu.pipeline_mode<synchronous>, transform_indices = @transform_2, window_bounds = array<i64: 1, 64>}, {pipeline_mode = #tpu.pipeline_mode<synchronous>, transform_indices = @transform_3, window_bounds = array<i64: 64, 32>}, {pipeline_mode = #tpu.pipeline_mode<synchronous>, transform_indices = @transform_4, window_bounds = array<i64: 1, 32>}, {pipeline_mode = #tpu.pipeline_mode<synchronous>, transform_indices = @transform_5, window_bounds = array<i64: 1, 32>}, {pipeline_mode = #tpu.pipeline_mode<synchronous>, transform_indices = @transform_6, window_bounds = array<i64: 1, 32>}, {transform_indices = @transform_7, window_bounds = array<i64: 16, 32>}]} {
    %c0 = arith.constant 0 : index
    %c0_0 = arith.constant 0 : index
    %0 = vector.load %arg1[%c0, %c0_0] : memref<16x32xbf16, #tpu.memory_space<vmem>>, vector<16x32xbf16>
    %c0_1 = arith.constant 0 : index
    %c0_2 = arith.constant 0 : index
    %1 = vector.load %arg2[%c0_1, %c0_2] : memref<32x64xbf16, #tpu.memory_space<vmem>>, vector<32x64xbf16>
    %cst = arith.constant dense<0.000000e+00> : vector<16x64xf32>
    %2 = tpu.matmul %0, %1, %cst {dimension_numbers = #tpu.dot_dimension_numbers<[1], [0], [0], [1], [0, 0, 1, 1], [], []>} : vector<16x32xbf16>, vector<32x64xbf16>, vector<16x64xf32> -> vector<16x64xf32>
    %c0_3 = arith.constant 0 : index
    %c0_4 = arith.constant 0 : index
    %3 = vector.load %arg3[%c0_3, %c0_4] : memref<1x64xf32, #tpu.memory_space<vmem>>, vector<1x64xf32>
    %4 = vector.broadcast %3 : vector<1x64xf32> to vector<16x64xf32>
    %5 = arith.addf %2, %4 : vector<16x64xf32>
    %cst_5 = arith.constant 0.000000e+00 : f32
    %6 = vector.broadcast %cst_5 : f32 to vector<16x64xf32>
    %7 = arith.maximumf %5, %6 : vector<16x64xf32>
    %8 = arith.truncf %7 : vector<16x64xf32> to vector<16x64xbf16>
    %9 = arith.extf %0 : vector<16x32xbf16> to vector<16x32xf32>
    %c0_6 = arith.constant 0 : index
    %c0_7 = arith.constant 0 : index
    %10 = vector.load %arg4[%c0_6, %c0_7] : memref<64x32xbf16, #tpu.memory_space<vmem>>, vector<64x32xbf16>
    %cst_8 = arith.constant dense<0.000000e+00> : vector<16x32xf32>
    %11 = tpu.matmul %8, %10, %cst_8 {dimension_numbers = #tpu.dot_dimension_numbers<[1], [0], [0], [1], [0, 0, 1, 1], [], []>} : vector<16x64xbf16>, vector<64x32xbf16>, vector<16x32xf32> -> vector<16x32xf32>
    %12 = arith.addf %9, %11 : vector<16x32xf32>
    %c0_9 = arith.constant 0 : index
    %c0_10 = arith.constant 0 : index
    %13 = vector.load %arg5[%c0_9, %c0_10] : memref<1x32xf32, #tpu.memory_space<vmem>>, vector<1x32xf32>
    %14 = vector.broadcast %13 : vector<1x32xf32> to vector<16x32xf32>
    %15 = arith.addf %12, %14 : vector<16x32xf32>
    %c0_11 = arith.constant 0 : index
    %c0_12 = arith.constant 0 : index
    %16 = vector.load %arg6[%c0_11, %c0_12] : memref<1x32xf32, #tpu.memory_space<vmem>>, vector<1x32xf32>
    %c0_13 = arith.constant 0 : index
    %c0_14 = arith.constant 0 : index
    %17 = vector.load %arg7[%c0_13, %c0_14] : memref<1x32xf32, #tpu.memory_space<vmem>>, vector<1x32xf32>
    %cst_15 = arith.constant dense<0.000000e+00> : vector<16xf32>
    %18 = vector.multi_reduction <add>, %15, %cst_15 [1] : vector<16x32xf32> to vector<16xf32>
    %19 = vector.shape_cast %18 : vector<16xf32> to vector<16x1xf32>
    %cst_16 = arith.constant 3.200000e+01 : f32
    %20 = vector.broadcast %cst_16 : f32 to vector<16x1xf32>
    %21 = arith.divf %19, %20 : vector<16x1xf32>
    %22 = arith.mulf %15, %15 : vector<16x32xf32>
    %cst_17 = arith.constant dense<0.000000e+00> : vector<16xf32>
    %23 = vector.multi_reduction <add>, %22, %cst_17 [1] : vector<16x32xf32> to vector<16xf32>
    %24 = vector.shape_cast %23 : vector<16xf32> to vector<16x1xf32>
    %cst_18 = arith.constant 3.200000e+01 : f32
    %25 = vector.broadcast %cst_18 : f32 to vector<16x1xf32>
    %26 = arith.divf %24, %25 : vector<16x1xf32>
    %27 = arith.mulf %21, %21 : vector<16x1xf32>
    %28 = arith.subf %26, %27 : vector<16x1xf32>
    %cst_19 = arith.constant 0.000000e+00 : f32
    %29 = vector.broadcast %cst_19 : f32 to vector<16x1xf32>
    %30 = arith.maximumf %28, %29 : vector<16x1xf32>
    %31 = vector.broadcast %21 : vector<16x1xf32> to vector<16x32xf32>
    %32 = arith.subf %15, %31 : vector<16x32xf32>
    %cst_20 = arith.constant 9.99999974E-6 : f32
    %33 = vector.broadcast %cst_20 : f32 to vector<16x1xf32>
    %34 = arith.addf %30, %33 : vector<16x1xf32>
    %35 = math.rsqrt %34 : vector<16x1xf32>
    %36 = vector.broadcast %35 : vector<16x1xf32> to vector<16x32xf32>
    %37 = arith.mulf %32, %36 : vector<16x32xf32>
    %38 = vector.broadcast %16 : vector<1x32xf32> to vector<16x32xf32>
    %39 = arith.mulf %37, %38 : vector<16x32xf32>
    %40 = vector.broadcast %17 : vector<1x32xf32> to vector<16x32xf32>
    %41 = arith.addf %39, %40 : vector<16x32xf32>
    %c0_21 = arith.constant 0 : index
    %c0_22 = arith.constant 0 : index
    %42 = vector.load %arg8[%c0_21, %c0_22] : memref<16x32xf32, #tpu.memory_space<vmem>>, vector<16x32xf32>
    tpu.vector_store %arg8[%c0_21, %c0_22], %41 {strides = array<i32>} : memref<16x32xf32, #tpu.memory_space<vmem>>, vector<16x32xf32>,
    return
  }
  func.func @transform_0(%arg0: i32) -> (i32, i32) {
    %c0_i32 = arith.constant 0 : i32
    %c0_i32_0 = arith.constant 0 : i32
    return %arg0, %c0_i32 : i32, i32
  }
  func.func @transform_1(%arg0: i32) -> (i32, i32) {
    %c0_i32 = arith.constant 0 : i32
    %c0_i32_0 = arith.constant 0 : i32
    %c0_i32_1 = arith.constant 0 : i32
    return %c0_i32, %c0_i32_0 : i32, i32
  }
  func.func @transform_2(%arg0: i32) -> (i32, i32) {
    %c0_i32 = arith.constant 0 : i32
    %c0_i32_0 = arith.constant 0 : i32
    %c0_i32_1 = arith.constant 0 : i32
    return %c0_i32, %c0_i32_0 : i32, i32
  }
  func.func @transform_3(%arg0: i32) -> (i32, i32) {
    %c0_i32 = arith.constant 0 : i32
    %c0_i32_0 = arith.constant 0 : i32
    %c0_i32_1 = arith.constant 0 : i32
    return %c0_i32, %c0_i32_0 : i32, i32
  }
  func.func @transform_4(%arg0: i32) -> (i32, i32) {
    %c0_i32 = arith.constant 0 : i32
    %c0_i32_0 = arith.constant 0 : i32
    %c0_i32_1 = arith.constant 0 : i32
    return %c0_i32, %c0_i32_0 : i32, i32
  }
  func.func @transform_5(%arg0: i32) -> (i32, i32) {
    %c0_i32 = arith.constant 0 : i32
    %c0_i32_0 = arith.constant 0 : i32
    %c0_i32_1 = arith.constant 0 : i32
    return %c0_i32, %c0_i32_0 : i32, i32
  }
  func.func @transform_6(%arg0: i32) -> (i32, i32) {
    %c0_i32 = arith.constant 0 : i32
    %c0_i32_0 = arith.constant 0 : i32
    %c0_i32_1 = arith.constant 0 : i32
    return %c0_i32, %c0_i32_0 : i32, i32
  }
  func.func @transform_7(%arg0: i32) -> (i32, i32) {
    %c0_i32 = arith.constant 0 : i32
    %c0_i32_0 = arith.constant 0 : i32
    return %arg0, %c0_i32 : i32, i32
  }
}

</mosaic_0001>

<bundles_post_ra>
// kernel: decoder_forward.6
= control target key start
LH: loop header
LB: loop body
LE: loop exit
PB: predicated region body
PF: predicated region fallthrough
CT: control target
= control target key end

     0   :  { %s877_s27 = smov 0   ;;  %s974_s0 = inlined_call_operand.vmem [shape: bf16[2,8,32], index: 0, kind: input, shape index: {}]   ;;  %s975_s1 = inlined_call_operand.vmem [shape: f32[1,8,8], index: 1, kind: input, shape index: {}]   ;;  %s976_s2 = inlined_call_operand.vmem [shape: bf16[32,96], index: 2, kind: input, shape index: {}]   ;;  %s977_s3 = inlined_call_operand.vmem [shape: f32[1,96], index: 3, kind: input, shape index: {}]   ;;  %s978_s4 = inlined_call_operand.vmem [shape: bf16[32,32], index: 4, kind: input, shape index: {}]   ;;  %s979_s5 = inlined_call_operand.vmem [shape: f32[1,32], index: 5, kind: input, shape index: {}]   ;;  %s980_s6 = inlined_call_operand.vmem [shape: f32[1,32], index: 6, kind: input, shape index: {}]   ;;  %s981_s7 = inlined_call_operand.vmem [shape: f32[1,32], index: 7, kind: input, shape index: {}]   ;;  %s982_s8 = inlined_call_operand.vmem [shape: bf16[2,8,32], index: 8, kind: output, shape index: {}]  }
   0x1 LB: > { %s723_s28 = sadd.s32 4294967295, %s815_s27   ;;  %p727_p0 = scmp.ge.s32.totalorder %s815_s27, 1  ;;  %s815_s27 = sphi %s877_s27, %s18_s27  }
   0x2   : > { %p261_p1 = scmp.lt.s32.totalorder %s815_s27, 3 }
   0x4   : > { %p262_p2 = pnand %p727_p0, %p261_p1 }
   0x5   : > { %p293_p3 = scmp.lt.s32.totalorder (!%p262_p2), %s723_s28, 1  ;;  %s817_s17 = smov (!%p262_p2), 104  }
   0x6   : > { %265 = sbr.rel (%p262_p2) target bundleno = 1241 (0x4d9), region = 52  ;;  %s818_s18 = smov (!%p262_p2), 120  }
   0x7   : > { %s819_s19 = smov (!%p262_p2), 96   ;;  %s820_s20 = smov (!%p262_p2), 80  }
   0x8   : > { %s821_s21 = smov (!%p262_p2), 72   ;;  %s822_s22 = smov (!%p262_p2), 88  }
   0x9   : > { %s823_s23 = smov (!%p262_p2), 112   ;;  %s824_s26 = smov (!%p262_p2), 64  }
   0xa   : > { %s825_s29 = smov (!%p262_p2), 40   ;;  %s826_s30 = smov (!%p262_p2), 56  }
   0xb   : > { %v759_v0 = vld [vmem:[%s976_s2 + $0x8] sm:$0xff]  ;;  %v758_v1 = vld [vmem:[%s976_s2] sm:$0xff]  ;;  %s984_s28 = smov (!%p293_p3, %s723_s28), 1  ;;  %vm324_vm0 = vcmask 261120   ;;  %vm347_vm1 = vcmask 64512   ;;  %vm384_vm2 = vcmask 1043456  }
   0xc   : > { %334 = vmatpush.bf16.msra.mxu0 %v759_v0  ;;  %s728_s11 = sshll.u32 %s984_s28, 2  ;;  %v785_v3 = vld [vmem:[%s977_s3] ss:$0 sm:$0xff]  ;;  %s827_s9 = smov 48   ;;  %vm582_vm3 = vcmask 130048   ;;  %vm584_vm4 = vcmask 195584  }
   0xd   : > { %s296_s14 = scalar_lea.vmem %s974_s0, %s728_s11  ;;  %v302_v21 = vld [vmem:[%s975_s1] sm:$0xff]  ;;  %s828_s10 = smov 8   ;;  %vm668_vm9 = vcmask 257024  }
   0xe   : > { %v899_v2 = vld [vmem:[%s296_s14] sm:$0xf]  ;;  %s829_s12 = smov 16   ;;  %s830_s13 = smov 24  }
  0x10   : > { %335 = vmatpush.bf16.msra.mxu0 %v758_v1 }
  0x13   : > { %738 = vmatmul.msk.bf16.vlgmr.msra.gmra.mxu0 %vm324_vm0, %v899_v2 }
  0x90   : > { %v337_v4 = vpop.f32.mrf.mxu0 }
  0x91   : > { %v338_v5 = vadd.f32 %v785_v3, %v337_v4 }
  0x93   : > { %v341_v6 = vpack.c.bf16 %v338_v5, %v338_v5 }
  0x95   : > { %v343_v7 = vunpack.c.l.b16 %v341_v6 }
  0x97   : > { %v906_v8 = vpack.c.b16 %v343_v7, %v343_v7 }
  0x98   : > { %v339_v9 = vpop.f32.mrf.mxu0 }
  0x99   : > { %513 = vrot.lane.b32.xlu2 %v906_v8, %s817_s17  ;;  %401 = vrot.lane.b32.xlu1 %v906_v8, %s818_s18 }
  0x9a   : > { %345 = vrot.lane.b32.xlu0 %v906_v8, %s819_s19 }
  0xa1   : > { %459 = vrot.lane.b32.xlu2 %v906_v8, %s820_s20  ;;  %515 = vrot.lane.b32.xlu1 %v906_v8, %s821_s21 }
  0xa2   : > { %403 = vrot.lane.b32.xlu0 %v906_v8, %s822_s22 }
  0xaa   : > { %457 = vrot.lane.b32.xlu0 %v906_v8, %s823_s23 }
  0xf3   : > { %v514_v10 = vpop.permute.xlu2 %513 }
  0xfb   : > { %v460_v11 = vpop.permute.xlu2 %459 }
  0xfc   : > { %v465_v12 = vsel %vm347_vm1, %v460_v11, 0 }
  0xfd   : > { %474 = vmatpush.bf16.xpose.msrb.mxu0 %v465_v12 }
 0x10b   : > { %v402_v13 = vpop.permute.xlu1 %401 }
 0x10c   : > { %v346_v14 = vpop.permute.xlu0 %345 }
 0x10d   : > { %v352_v15 = vsel %vm347_vm1, %v346_v14, 0 }
 0x10e   : > { %361 = vmatpush.bf16.xpose.msra.mxu1 %v352_v15 }
 0x113   : > { %v516_v16 = vpop.permute.xlu1 %515 }
 0x114   : > { %v404_v17 = vpop.permute.xlu0 %403  ;;  %v521_v18 = vsel %vm347_vm1, %v516_v16, 0 }
 0x115   : > { %739 = vmatmul.msk.bf16.vlgmr.msra.gmra.mxu1 %vm347_vm1, %v341_v6  ;;  %v409_v19 = vsel %vm347_vm1, %v404_v17, 0 }
 0x116   : > { %418 = vmatpush.bf16.xpose.msra.mxu3 %v409_v19 }
 0x11c   : > { %v458_v20 = vpop.permute.xlu0 %457 }
 0x11d   : > { %741 = vmatmul.msk.bf16.vlgmr.msra.gmra.mxu3 %vm347_vm1, %v402_v13  ;;  %743 = vmatmul.msk.bf16.vlgmr.msrb.gmra.mxu0 %vm347_vm1, %v458_v20 }
 0x11e   : > { %530 = vmatpush.bf16.xpose.msrb.mxu3 %v521_v18 }
 0x12d   : > { %745 = vmatmul.msk.bf16.vlgmr.msrb.gmra.mxu3 %vm347_vm1, %v514_v10 }
 0x192   : > { %v363_v22 = vpop.f32.mrf.mxu1 }
 0x193   : > { %v364_v23 = vadd.f32 %v363_v22, %v302_v21 }
 0x195   : > { %v367_v24 = vsel %vm347_vm1, %v364_v23, -inf }
 0x196   : > { %368 = vmax.xlane.f32.xlu1 %v367_v24 }
 0x19a   : > { %v365_v25 = vpop.f32.mrf.mxu1  ;;  %v476_v26 = vpop.f32.mrf.mxu0 }
 0x19b   : > { %v477_v31 = vadd.f32 %v476_v26, %v302_v21 }
 0x19d   : > { %v480_v33 = vsel %vm347_vm1, %v477_v31, -inf }
 0x1a0   : > { %v420_v27 = vpop.f32.mrf.mxu3 }
 0x1a1   : > { %v421_v28 = vadd.f32 %v420_v27, %v302_v21  ;;  %v761_v27 = vld [vmem:[%s978_s4 + $0x8] sm:$0xff] }
 0x1a2   : > { %v478_v29 = vpop.f32.mrf.mxu0  ;;  %616 = vmatpush.bf16.msra.mxu0 %v761_v27 }
 0x1a3   : > { %v424_v30 = vsel %vm347_vm1, %v421_v28, -inf }
 0x1a4   : > { %425 = vmax.xlane.f32.xlu2 %v424_v30 }
 0x1a8   : > { %v422_v32 = vpop.f32.mrf.mxu3 }
 0x1ac   : > { %481 = vmax.xlane.f32.xlu2 %v480_v33 }
 0x1b0   : > { %v532_v34 = vpop.f32.mrf.mxu3 }
 0x1b1   : > { %v533_v35 = vadd.f32 %v532_v34, %v302_v21 }
 0x1b3   : > { %v536_v36 = vsel %vm347_vm1, %v533_v35, -inf }
 0x1b4   : > { %537 = vmax.xlane.f32.xlu0 %v536_v36  ;;  %v786_v36 = vld [vmem:[%s979_s5] ss:$0 sm:$0xff] }
 0x1b8   : > { %v534_v37 = vpop.f32.mrf.mxu3 }
 0x1b9   : > { %v623_v37 = vunpack.c.l.bf16 %v899_v2 }
 0x1c4   : > { %379 = vrot.lane.b32.xlu2 %v906_v8, %s824_s26  ;;  %s300_s26 = scalar_lea.vmem %s982_s8, %s728_s11 }
 0x1cc   : > { %548 = vrot.lane.b32.xlu2 %v906_v8, %s825_s29 }
 0x209   : > { %v369_v38 = vpop.xlane.xlu1 %368 }
 0x20a   : > { %v370_v39 = vsub.f32 %v364_v23, %v369_v38 }
 0x20c   : > { %v371_v40 = vmul.f32 1.442695, %v370_v39 }
 0x20e   : > { %789 = vpow2.f32 %v371_v40 }
 0x214   : > { %v790_v41 = vpop.eup %789 }
 0x215   : > { %v373_v42 = vsel %vm347_vm1, %v790_v41, 0.0 }
 0x216   : > { %374 = vadd.xlane.f32.xlu1 %v373_v42 }
 0x217   : > { %v426_v43 = vpop.xlane.xlu2 %425 }
 0x218   : > { %v427_v46 = vsub.f32 %v421_v28, %v426_v43  ;;  %v760_v28 = vld [vmem:[%s978_s4] sm:$0xff] }
 0x219   : > { %617 = vmatpush.bf16.msra.mxu0 %v760_v28 }
 0x21a   : > { %v428_v48 = vmul.f32 1.442695, %v427_v46 }
 0x21f   : > { %v482_v44 = vpop.xlane.xlu2 %481 }
 0x220   : > { %v483_v45 = vsub.f32 %v477_v31, %v482_v44 }
 0x222   : > { %v484_v47 = vmul.f32 1.442695, %v483_v45  ;;  %v831_v45 = vmov 32.0  }
 0x224   : > { %791 = vpow2.f32 %v484_v47 }
 0x225   : > { %793 = vpow2.f32 %v428_v48 }
 0x227   : > { %v380_v49 = vpop.permute.xlu2 %379  ;;  %v538_v50 = vpop.xlane.xlu0 %537 }
 0x228   : > { %v386_v51 = vsel %vm384_vm2, %v380_v49, 0  ;;  %v539_v53 = vsub.f32 %v533_v35, %v538_v50 }
 0x229   : > { %395 = vmatpush.bf16.msra.mxu2 %v386_v51 }
 0x22a   : > { %v792_v52 = vpop.eup %791  ;;  %v540_v55 = vmul.f32 1.442695, %v539_v53 }
 0x22b   : > { %v486_v54 = vsel %vm347_vm1, %v792_v52, 0.0  ;;  %v794_v56 = vpop.eup %793 }
 0x22c   : > { %487 = vadd.xlane.f32.xlu0 %v486_v54  ;;  %795 = vpow2.f32 %v540_v55  ;;  %v430_v57 = vsel %vm347_vm1, %v794_v56, 0.0 }
 0x22f   : > { %436 = vrot.lane.b32.xlu1 %v906_v8, %s826_s30  ;;  %v549_v1 = vpop.permute.xlu2 %548 }
 0x230   : > { %v554_v5 = vsel %vm384_vm2, %v549_v1, 0 }
 0x232   : > { %v796_v58 = vpop.eup %795 }
 0x233   : > { %v542_v59 = vsel %vm347_vm1, %v796_v58, 0.0 }
 0x234   : > { %431 = vadd.xlane.f32.xlu0 %v430_v57 }
 0x23c   : > { %543 = vadd.xlane.f32.xlu0 %v542_v59 }
 0x250   : > { %492 = vrot.lane.b32.xlu0 %v906_v8, %s827_s9 }
 0x289   : > { %v375_v60 = vpop.xlane.xlu1 %374 }
 0x28a   : > { %797 = vrcp.f32 %v375_v60 }
 0x290   : > { %v798_v61 = vpop.eup %797 }
 0x291   : > { %v377_v62 = vmul.f32 %v798_v61, %v790_v41 }
 0x293   : > { %v378_v63 = vpack.c.bf16 %v377_v62, %v377_v62 }
 0x295   : > { %740 = vmatmul.msk.bf16.vlgmr.msra.gmra.mxu2 %vm347_vm1, %v378_v63 }
 0x29f   : > { %v488_v0 = vpop.xlane.xlu0 %487 }
 0x2a1   : > { %v437_v3 = vpop.permute.xlu1 %436 }
 0x2a2   : > { %v442_v4 = vsel %vm384_vm2, %v437_v3, 0  ;;  %v787_v3 = vld [vmem:[%s980_s6] ss:$0 sm:$0xff] }
 0x2a3   : > { %451 = vmatpush.bf16.msrb.mxu2 %v442_v4 }
 0x2a7   : > { %563 = vmatpush.bf16.msra.mxu2 %v554_v5  ;;  %v432_v6 = vpop.xlane.xlu0 %431  ;;  %v788_v5 = vld [vmem:[%s981_s7] ss:$0 sm:$0xff] }
 0x2a8   : > { %799 = vrcp.f32 %v432_v6 }
 0x2ae   : > { %v800_v7 = vpop.eup %799 }
 0x2af   : > { %v434_v8 = vmul.f32 %v800_v7, %v794_v56  ;;  %v544_v9 = vpop.xlane.xlu0 %543 }
 0x2b0   : > { %801 = vrcp.f32 %v544_v9 }
 0x2b1   : > { %v435_v10 = vpack.c.bf16 %v434_v8, %v434_v8  ;;  %803 = vrcp.f32 %v488_v0 }
 0x2b2   : > { %805 = vrcp.f32 %v831_v45 }
 0x2b3   : > { %742 = vmatmul.msk.bf16.vlgmr.msrb.gmra.mxu2 %vm347_vm1, %v435_v10 }
 0x2b6   : > { %v802_v11 = vpop.eup %801 }
 0x2b7   : > { %v546_v12 = vmul.f32 %v802_v11, %v796_v58  ;;  %v804_v13 = vpop.eup %803 }
 0x2b8   : > { %v490_v14 = vmul.f32 %v804_v13, %v792_v52  ;;  %v806_v46 = vpop.eup %805 }
 0x2b9   : > { %v547_v15 = vpack.c.bf16 %v546_v12, %v546_v12  ;;  %v631_v47 = vmul.f32 32.0, %v806_v46  ;;  %vm635_vm5 = vweird.f32 %v806_v46 }
 0x2ba   : > { %v491_v18 = vpack.c.bf16 %v490_v14, %v490_v14 }
 0x2bb   : > { %v632_v48 = vsub.f32 1.0, %v631_v47 }
 0x2bd   : > { %v633_v49 = vmul.f32 %v806_v46, %v632_v48 }
 0x2bf   : > { %v634_v50 = vadd.f32 %v806_v46, %v633_v49 }
 0x2c1   : > { %v636_v2 = vsel %vm635_vm5, %v806_v46, %v634_v50 }
 0x2c2   : > { %v493_v16 = vpop.permute.xlu0 %492 }
 0x2c3   : > { %746 = vmatmul.msk.bf16.vlgmr.msra.gmra.mxu2 %vm347_vm1, %v547_v15  ;;  %v498_v17 = vsel %vm384_vm2, %v493_v16, 0 }
 0x2c4   : > { %507 = vmatpush.bf16.msrb.mxu1 %v498_v17 }
 0x2c7   : > { %744 = vmatmul.msk.bf16.vlgmr.msrb.gmra.mxu1 %vm347_vm1, %v491_v18 }
 0x318   : > { %v397_v19 = vpop.f32.mrf.mxu2 }
 0x320   : > { %v399_v20 = vpop.f32.mrf.mxu2 }
 0x336   : > { %v453_v21 = vpop.f32.mrf.mxu2 }
 0x337   : > { %570 = vrot.lane.b32.xlu1 %v453_v21, %s828_s10 }
 0x33e   : > { %v455_v22 = vpop.f32.mrf.mxu2 }
 0x344   : > { %v509_v23 = vpop.f32.mrf.mxu1 }
 0x345   : > { %574 = vrot.lane.b32.xlu2 %v509_v23, %s829_s12 }
 0x346   : > { %v565_v24 = vpop.f32.mrf.mxu2 }
 0x347   : > { %578 = vrot.lane.b32.xlu1 %v565_v24, %s830_s13 }
 0x34c   : > { %v511_v25 = vpop.f32.mrf.mxu1 }
 0x34e   : > { %v567_v26 = vpop.f32.mrf.mxu2 }
 0x39f   : > { %v575_v31 = vpop.permute.xlu2 %574 }
 0x3a9   : > { %v571_v29 = vpop.permute.xlu1 %570 }
 0x3aa   : > { %v581_v30 = vsel %vm347_vm1, %v397_v19, %v571_v29 }
 0x3ab   : > { %v583_v33 = vsel %vm582_vm3, %v581_v30, %v575_v31 }
 0x3b9   : > { %v579_v32 = vpop.permute.xlu1 %578 }
 0x3ba   : > { %v585_v34 = vsel %vm584_vm4, %v583_v33, %v579_v32 }
 0x3bb   : > { %v586_v35 = vpack.c.bf16 %v585_v34, %v585_v34 }
 0x3bd   : > { %755 = vmatmul.msk.bf16.vlgmr.msra.gmra.mxu0 %vm324_vm0, %v586_v35 }
 0x43a   : > { %v619_v38 = vpop.f32.mrf.mxu0 }
 0x43b   : > { %v620_v39 = vadd.f32 %v786_v36, %v619_v38 }
 0x43d   : > { %v624_v40 = vadd.f32 %v623_v37, %v620_v39 }
 0x43f   : > { %v627_v41 = vsel %vm324_vm0, %v624_v40, 0.0  ;;  %v638_v42 = vmul.f32 %v624_v40, %v624_v40 }
 0x440   : > { %628 = vadd.xlane.f32.xlu2 %v627_v41 }
 0x441   : > { %v639_v43 = vsel %vm324_vm0, %v638_v42, 0.0 }
 0x442   : > { %v621_v44 = vpop.f32.mrf.mxu0  ;;  %640 = vadd.xlane.f32.xlu1 %v639_v43 }
 0x4b3   : > { %v629_v51 = vpop.xlane.xlu2 %628 }
 0x4b4   : > { %v637_v52 = vmul.f32 %v636_v2, %v629_v51 }
 0x4b5   : > { %v641_v53 = vpop.xlane.xlu1 %640 }
 0x4b6   : > { %v643_v54 = vmul.f32 %v637_v52, %v637_v52  ;;  %v642_v55 = vmul.f32 %v641_v53, %v636_v2  ;;  %v646_v1 = vsub.f32 %v624_v40, %v637_v52 }
 0x4b8   : > { %v644_v56 = vsub.f32 %v642_v55, %v643_v54 }
 0x4ba   : > { %v645_v57 = vmax.f32 %v644_v56, 0.0 }
 0x4bc   : > { %v647_v58 = vadd.f32 1e-05, %v645_v57 }
 0x4be   : > { %807 = vrsqrt.f32 %v647_v58  ;;  %vm654_vm7 = vweird.f32 %v647_v58 }
 0x4c4   : > { %v808_v59 = vpop.eup %807 }
 0x4c5   : > { %v649_v60 = vmul.f32 %v808_v59, %v647_v58  ;;  %vm655_vm6 = vweird.f32 %v808_v59 }
 0x4c6   : > { %vm656_vm8 = vmor %vm654_vm7, %vm655_vm6 }
 0x4c7   : > { %v650_v61 = vmul.f32 %v808_v59, %v649_v60 }
 0x4c9   : > { %v651_v62 = vmul.f32 0.5, %v650_v61 }
 0x4cb   : > { %v652_v63 = vsub.f32 1.5, %v651_v62 }
 0x4cd   : > { %v653_v0 = vmul.f32 %v808_v59, %v652_v63 }
 0x4cf   : > { %v657_v4 = vsel %vm656_vm8, %v808_v59, %v653_v0 }
 0x4d0   : > { %v658_v6 = vmul.f32 %v657_v4, %v646_v1 }
 0x4d2   : > { %v662_v7 = vmul.f32 %v787_v3, %v658_v6 }
 0x4d4   : > { %v666_v8 = vadd.f32 %v788_v5, %v662_v7 }
 0x4d6   : > { %v667_v9 = vpack.c.bf16 %v666_v8, %v666_v8 }
 0x4d8   : > { %669 = vst.msk [vmem:[%s300_s26] sm:$0xf] %vm668_vm9, %v667_v9 }
 0x4d9 PF: > { %s18_s27 = sadd.s32 1, %s815_s27  }
 0x4da   : > { %p15_p4 = scmp.ge.s32.totalorder %s18_s27, 4  }
 0x4dc   :  { %17 = sbr.rel (!%p15_p4) target bundleno = 1 (0x1), region = 82 }

// kernel: decoder_forward.11
= control target key start
LH: loop header
LB: loop body
LE: loop exit
PB: predicated region body
PF: predicated region fallthrough
CT: control target
= control target key end

     0   :  { %s392_s0 = inlined_call_operand.vmem [shape: bf16[16,32], index: 0, kind: input, shape index: {}]   ;;  %s393_s1 = inlined_call_operand.vmem [shape: bf16[32,64], index: 1, kind: input, shape index: {}]   ;;  %s394_s2 = inlined_call_operand.vmem [shape: f32[1,64], index: 2, kind: input, shape index: {}]   ;;  %s395_s3 = inlined_call_operand.vmem [shape: bf16[64,32], index: 3, kind: input, shape index: {}]   ;;  %s396_s4 = inlined_call_operand.vmem [shape: f32[1,32], index: 4, kind: input, shape index: {}]   ;;  %s397_s5 = inlined_call_operand.vmem [shape: f32[1,32], index: 5, kind: input, shape index: {}]   ;;  %s398_s6 = inlined_call_operand.vmem [shape: f32[1,32], index: 6, kind: input, shape index: {}]   ;;  %s399_s7 = inlined_call_operand.hbm [shape: f32[16,32], index: 7, kind: output, shape index: {}]  }
   0x1   :  { %v257_v0 = vld [vmem:[%s393_s1 + $0x8] sm:$0xff]  ;;  %v256_v1 = vld [vmem:[%s393_s1] sm:$0xff] }
   0x2   :  { %65 = vmatpush.bf16.msra.mxu0 %v257_v0 }
   0x3   :  { %12 = vsyncpa [#allocation3], 0  ;;  %v255_v2 = vld [vmem:[%s392_s0] sm:$0xff]  ;;  %vm55_vm0 = vcmask 261120   ;;  %v261_v3 = vld [vmem:[%s395_s3 + $0x18] sm:$0xff]  ;;  %vm110_vm1 = vcmask 523264  }
   0x4   :  { %118 = vmatpush.bf16.msra.mxu1 %v261_v3  ;;  %v260_v4 = vld [vmem:[%s395_s3 + $0x10] sm:$0xff]  ;;  %v259_v5 = vld [vmem:[%s395_s3 + $0x8] sm:$0xff]  ;;  %v258_v6 = vld [vmem:[%s395_s3] sm:$0xff]  ;;  %v302_v31 = vmov 32.0   ;;  %s213_s23 = sshll.u32 %s399_s7, 4  ;;  %s305_s24 = smov 8   ;;  %s214_s23 = int_to_ptr.hbm [resolvable:$true] %s213_s23 }
   0x5   :  { %v266_v8 = vld [vmem:[%s394_s2] ss:$0 sm:$0xff]  ;;  %270 = vrcp.f32 %v302_v31 }
   0x6   :  { %66 = vmatpush.bf16.msra.mxu0 %v256_v1  ;;  %v28_v15 = vld [vmem:[%s392_s0] sm:$0xff]  }
   0x7   :  { %v76_v16 = vunpack.c.l.bf16 %v28_v15  ;;  %v267_v17 = vld [vmem:[%s396_s4] ss:$0 sm:$0xff]  ;;  %v77_v22 = vunpack.c.h.bf16 %v28_v15 }
   0x8   :  { %119 = vmatpush.bf16.msra.mxu1 %v260_v4  ;;  %v268_v62 = vld [vmem:[%s397_s5] ss:$0 sm:$0xff]  ;;  %s303_s5 = smov [#allocation2]  }
   0x9   :  { %237 = vmatmul.msk.bf16.vlgmr.msra.gmra.mxu0 %vm55_vm0, %v255_v2  ;;  %v269_v3 = vld [vmem:[%s398_s6] ss:$0 sm:$0xff]  ;;  %s211_s20 = sshll.u32 %s303_s5, 4  ;;  %s304_s6 = smov 128   ;;  %s212_s20 = int_to_ptr.vmem [resolvable:$true] %s211_s20 }
   0xb   :  { %v271_v32 = vpop.eup %270 }
   0xc   :  { %120 = vmatpush.bf16.msra.mxu1 %v259_v5  ;;  %v145_v33 = vmul.f32 32.0, %v271_v32  ;;  %vm149_vm2 = vweird.f32 %v271_v32 }
   0xe   :  { %v146_v34 = vsub.f32 1.0, %v145_v33 }
  0x10   :  { %121 = vmatpush.bf16.msra.mxu1 %v258_v6  ;;  %v147_v35 = vmul.f32 %v271_v32, %v146_v34 }
  0x12   :  { %v148_v36 = vadd.f32 %v271_v32, %v147_v35 }
  0x14   :  { %v150_v37 = vsel %vm149_vm2, %v271_v32, %v148_v36 }
  0x86   :  { %v68_v7 = vpop.f32.mrf.mxu0 }
  0x87   :  { %v69_v9 = vadd.f32 %v266_v8, %v68_v7 }
  0x89   :  { %v73_v12 = vmax.f32 %v69_v9, 0.0 }
  0x8e   :  { %v70_v10 = vpop.f32.mrf.mxu0 }
  0x8f   :  { %v71_v11 = vadd.f32 %v266_v8, %v70_v10 }
  0x91   :  { %v74_v13 = vmax.f32 %v71_v11, 0.0 }
  0x93   :  { %v75_v14 = vpack.c.bf16 %v74_v13, %v73_v12 }
  0x95   :  { %254 = vmatmul.msk.bf16.vlgmr.msra.gmra.mxu1 %vm110_vm1, %v75_v14 }
 0x112   :  { %v123_v18 = vpop.f32.mrf.mxu1 }
 0x113   :  { %v128_v19 = vadd.f32 %v123_v18, %v76_v16 }
 0x115   :  { %v134_v20 = vadd.f32 %v267_v17, %v128_v19 }
 0x117   :  { %v138_v21 = vsel %vm55_vm0, %v134_v20, 0.0  ;;  %v153_v23 = vmul.f32 %v134_v20, %v134_v20 }
 0x118   :  { %139 = vadd.xlane.f32.xlu0 %v138_v21 }
 0x119   :  { %v155_v24 = vsel %vm55_vm0, %v153_v23, 0.0 }
 0x11a   :  { %v125_v25 = vpop.f32.mrf.mxu1  ;;  %156 = vadd.xlane.f32.xlu1 %v155_v24 }
 0x11b   :  { %v129_v26 = vadd.f32 %v125_v25, %v77_v22 }
 0x11d   :  { %v135_v27 = vadd.f32 %v267_v17, %v129_v26 }
 0x11f   :  { %v141_v28 = vsel %vm55_vm0, %v135_v27, 0.0  ;;  %v154_v29 = vmul.f32 %v135_v27, %v135_v27 }
 0x120   :  { %142 = vadd.xlane.f32.xlu0 %v141_v28 }
 0x121   :  { %v158_v30 = vsel %vm55_vm0, %v154_v29, 0.0 }
 0x122   :  { %159 = vadd.xlane.f32.xlu1 %v158_v30 }
 0x18b   :  { %v140_v38 = vpop.xlane.xlu0 %139 }
 0x18c   :  { %v151_v39 = vmul.f32 %v150_v37, %v140_v38 }
 0x18d   :  { %v157_v40 = vpop.xlane.xlu1 %156 }
 0x18e   :  { %v163_v41 = vmul.f32 %v151_v39, %v151_v39  ;;  %v161_v42 = vmul.f32 %v157_v40, %v150_v37  ;;  %v169_v61 = vsub.f32 %v134_v20, %v151_v39 }
 0x190   :  { %v165_v43 = vsub.f32 %v161_v42, %v163_v41 }
 0x192   :  { %v167_v44 = vmax.f32 %v165_v43, 0.0 }
 0x193   :  { %v143_v45 = vpop.xlane.xlu0 %142 }
 0x194   :  { %v171_v46 = vadd.f32 1e-05, %v167_v44  ;;  %v152_v47 = vmul.f32 %v150_v37, %v143_v45 }
 0x195   :  { %v160_v48 = vpop.xlane.xlu1 %159 }
 0x196   :  { %272 = vrsqrt.f32 %v171_v46  ;;  %v164_v49 = vmul.f32 %v152_v47, %v152_v47  ;;  %v162_v50 = vmul.f32 %v160_v48, %v150_v37  ;;  %vm179_vm4 = vweird.f32 %v171_v46 }
 0x197   :  { %v170_v9 = vsub.f32 %v135_v27, %v152_v47 }
 0x198   :  { %v166_v51 = vsub.f32 %v162_v50, %v164_v49 }
 0x19a   :  { %v168_v52 = vmax.f32 %v166_v51, 0.0 }
 0x19c   :  { %v273_v53 = vpop.eup %272  ;;  %v172_v55 = vadd.f32 1e-05, %v168_v52 }
 0x19d   :  { %v174_v54 = vmul.f32 %v273_v53, %v171_v46  ;;  %vm180_vm3 = vweird.f32 %v273_v53 }
 0x19e   :  { %274 = vrsqrt.f32 %v172_v55  ;;  %vm181_vm5 = vmor %vm179_vm4, %vm180_vm3  ;;  %vm189_vm7 = vweird.f32 %v172_v55 }
 0x19f   :  { %v175_v56 = vmul.f32 %v273_v53, %v174_v54 }
 0x1a1   :  { %v176_v57 = vmul.f32 0.5, %v175_v56 }
 0x1a3   :  { %v177_v58 = vsub.f32 1.5, %v176_v57 }
 0x1a4   :  { %v275_v59 = vpop.eup %274 }
 0x1a5   :  { %v178_v60 = vmul.f32 %v273_v53, %v177_v58  ;;  %v184_v63 = vmul.f32 %v275_v59, %v172_v55  ;;  %vm190_vm6 = vweird.f32 %v275_v59 }
 0x1a6   :  { %vm191_vm8 = vmor %vm189_vm7, %vm190_vm6 }
 0x1a7   :  { %v182_v0 = vsel %vm181_vm5, %v273_v53, %v178_v60  ;;  %v185_v2 = vmul.f32 %v275_v59, %v184_v63 }
 0x1a8   :  { %v193_v1 = vmul.f32 %v182_v0, %v169_v61 }
 0x1a9   :  { %v186_v5 = vmul.f32 0.5, %v185_v2 }
 0x1aa   :  { %v198_v4 = vmul.f32 %v268_v62, %v193_v1 }
 0x1ab   :  { %v187_v6 = vsub.f32 1.5, %v186_v5 }
 0x1ac   :  { %v203_v7 = vadd.f32 %v269_v3, %v198_v4 }
 0x1ad   :  { %v188_v8 = vmul.f32 %v275_v59, %v187_v6 }
 0x1ae   :  { %205 = vst.msk [vmem:[#allocation2] sm:$0xff] %vm55_vm0, %v203_v7 }
 0x1af   :  { %v192_v10 = vsel %vm191_vm8, %v275_v59, %v188_v8 }
 0x1b0   :  { %v194_v11 = vmul.f32 %v192_v10, %v170_v9 }
 0x1b2   :  { %v199_v12 = vmul.f32 %v268_v62, %v194_v11 }
 0x1b4   :  { %v204_v13 = vadd.f32 %v269_v3, %v199_v12 }
 0x1b6   :  { %206 = vst.msk [vmem:[#allocation2 + $0x8] sm:$0xff] %vm55_vm0, %v204_v13 }
 0x1b7   :  { %219 = dma.vmem_to_hbm [thread:$0]  %s212_s20, 256, %s214_s23, [#allocation3], %s304_s6, %s304_s6, %s305_s24  }
 0x1b8   :  { %300 = dma.done.wait [#allocation3], 256  }
 0x1b9   :  { %301 = vsyncadd [#allocation3], 4294967040 }
 0x1ba   :  { %224 = vsyncpa [#allocation3], 1 }

// kernel: decoder_forward.8
= control target key start
LH: loop header
LB: loop body
LE: loop exit
PB: predicated region body
PF: predicated region fallthrough
CT: control target
= control target key end

     0   :  { %vm54_vm0 = vcmask 261120   ;;  %vm109_vm1 = vcmask 523264   ;;  %v261_v31 = vmov 32.0   ;;  %vm206_vm7 = vcmask 257024   ;;  %s355_s1 = inlined_call_operand.vmem [shape: bf16[32,64], index: 1, kind: input, shape index: {}]   ;;  %s356_s2 = inlined_call_operand.vmem [shape: f32[1,64], index: 2, kind: input, shape index: {}]   ;;  %s357_s0 = inlined_call_operand.vmem [shape: bf16[16,32], index: 0, kind: input, shape index: {}]   ;;  %s358_s4 = inlined_call_operand.vmem [shape: f32[1,32], index: 4, kind: input, shape index: {}]   ;;  %s359_s3 = inlined_call_operand.vmem [shape: bf16[64,32], index: 3, kind: input, shape index: {}]   ;;  %s360_s5 = inlined_call_operand.vmem [shape: f32[1,32], index: 5, kind: input, shape index: {}]   ;;  %s361_s6 = inlined_call_operand.vmem [shape: f32[1,32], index: 6, kind: input, shape index: {}]   ;;  %s362_s7 = inlined_call_operand.vmem [shape: bf16[16,32], index: 7, kind: output, shape index: {}]  }
   0x1   :  { %v245_v0 = vld [vmem:[%s355_s1 + $0x8] sm:$0xff]  ;;  %v244_v1 = vld [vmem:[%s355_s1] sm:$0xff]  ;;  %v249_v3 = vld [vmem:[%s359_s3 + $0x18] sm:$0xff]  ;;  %255 = vrcp.f32 %v261_v31 }
   0x2   :  { %64 = vmatpush.bf16.msra.mxu0 %v245_v0  ;;  %v243_v2 = vld [vmem:[%s357_s0] sm:$0xff]  ;;  %117 = vmatpush.bf16.msra.mxu1 %v249_v3  ;;  %v248_v4 = vld [vmem:[%s359_s3 + $0x10] sm:$0xff]  ;;  %v247_v5 = vld [vmem:[%s359_s3 + $0x8] sm:$0xff] }
   0x3   :  { %v246_v6 = vld [vmem:[%s359_s3] sm:$0xff] }
   0x4   :  { %v251_v8 = vld [vmem:[%s356_s2] ss:$0 sm:$0xff] }
   0x5   :  { %v27_v15 = vld [vmem:[%s357_s0] sm:$0xff]  }
   0x6   :  { %65 = vmatpush.bf16.msra.mxu0 %v244_v1  ;;  %118 = vmatpush.bf16.msra.mxu1 %v248_v4  ;;  %v75_v16 = vunpack.c.l.bf16 %v27_v15  ;;  %v252_v17 = vld [vmem:[%s358_s4] ss:$0 sm:$0xff]  ;;  %v76_v22 = vunpack.c.h.bf16 %v27_v15 }
   0x7   :  { %v256_v32 = vpop.eup %255  ;;  %v253_v62 = vld [vmem:[%s360_s5] ss:$0 sm:$0xff] }
   0x8   :  { %v144_v33 = vmul.f32 32.0, %v256_v32  ;;  %vm148_vm2 = vweird.f32 %v256_v32  ;;  %v254_v1 = vld [vmem:[%s361_s6] ss:$0 sm:$0xff] }
   0x9   :  { %225 = vmatmul.msk.bf16.vlgmr.msra.gmra.mxu0 %vm54_vm0, %v243_v2 }
   0xa   :  { %119 = vmatpush.bf16.msra.mxu1 %v247_v5  ;;  %v145_v34 = vsub.f32 1.0, %v144_v33 }
   0xc   :  { %v146_v35 = vmul.f32 %v256_v32, %v145_v34 }
   0xe   :  { %120 = vmatpush.bf16.msra.mxu1 %v246_v6  ;;  %v147_v36 = vadd.f32 %v256_v32, %v146_v35 }
  0x10   :  { %v149_v37 = vsel %vm148_vm2, %v256_v32, %v147_v36 }
  0x86   :  { %v67_v7 = vpop.f32.mrf.mxu0 }
  0x87   :  { %v68_v9 = vadd.f32 %v251_v8, %v67_v7 }
  0x89   :  { %v72_v12 = vmax.f32 %v68_v9, 0.0 }
  0x8e   :  { %v69_v10 = vpop.f32.mrf.mxu0 }
  0x8f   :  { %v70_v11 = vadd.f32 %v251_v8, %v69_v10 }
  0x91   :  { %v73_v13 = vmax.f32 %v70_v11, 0.0 }
  0x93   :  { %v74_v14 = vpack.c.bf16 %v73_v13, %v72_v12 }
  0x95   :  { %242 = vmatmul.msk.bf16.vlgmr.msra.gmra.mxu1 %vm109_vm1, %v74_v14 }
 0x112   :  { %v122_v18 = vpop.f32.mrf.mxu1 }
 0x113   :  { %v127_v19 = vadd.f32 %v122_v18, %v75_v16 }
 0x115   :  { %v133_v20 = vadd.f32 %v252_v17, %v127_v19 }
 0x117   :  { %v137_v21 = vsel %vm54_vm0, %v133_v20, 0.0  ;;  %v152_v23 = vmul.f32 %v133_v20, %v133_v20 }
 0x118   :  { %138 = vadd.xlane.f32.xlu0 %v137_v21 }
 0x119   :  { %v154_v24 = vsel %vm54_vm0, %v152_v23, 0.0 }
 0x11a   :  { %v124_v25 = vpop.f32.mrf.mxu1  ;;  %155 = vadd.xlane.f32.xlu1 %v154_v24 }
 0x11b   :  { %v128_v26 = vadd.f32 %v124_v25, %v76_v22 }
 0x11d   :  { %v335_v27 = vadd.f32 %v252_v17, %v128_v26 }
 0x11f   :  { %v140_v28 = vsel %vm54_vm0, %v335_v27, 0.0  ;;  %v153_v29 = vmul.f32 %v335_v27, %v335_v27 }
 0x120   :  { %141 = vadd.xlane.f32.xlu0 %v140_v28 }
 0x121   :  { %v157_v30 = vsel %vm54_vm0, %v153_v29, 0.0 }
 0x122   :  { %158 = vadd.xlane.f32.xlu1 %v157_v30 }
 0x18b   :  { %v139_v38 = vpop.xlane.xlu0 %138 }
 0x18c   :  { %v150_v39 = vmul.f32 %v149_v37, %v139_v38 }
 0x18d   :  { %v156_v40 = vpop.xlane.xlu1 %155 }
 0x18e   :  { %v162_v41 = vmul.f32 %v150_v39, %v150_v39  ;;  %v160_v42 = vmul.f32 %v156_v40, %v149_v37  ;;  %v168_v61 = vsub.f32 %v133_v20, %v150_v39 }
 0x190   :  { %v164_v43 = vsub.f32 %v160_v42, %v162_v41 }
 0x192   :  { %v166_v44 = vmax.f32 %v164_v43, 0.0 }
 0x193   :  { %v142_v45 = vpop.xlane.xlu0 %141 }
 0x194   :  { %v170_v46 = vadd.f32 1e-05, %v166_v44  ;;  %v151_v47 = vmul.f32 %v149_v37, %v142_v45 }
 0x195   :  { %v159_v48 = vpop.xlane.xlu1 %158 }
 0x196   :  { %257 = vrsqrt.f32 %v170_v46  ;;  %v163_v49 = vmul.f32 %v151_v47, %v151_v47  ;;  %v161_v50 = vmul.f32 %v159_v48, %v149_v37  ;;  %vm178_vm4 = vweird.f32 %v170_v46 }
 0x197   :  { %v169_v10 = vsub.f32 %v335_v27, %v151_v47 }
 0x198   :  { %v165_v51 = vsub.f32 %v161_v50, %v163_v49 }
 0x19a   :  { %v167_v52 = vmax.f32 %v165_v51, 0.0 }
 0x19c   :  { %v258_v53 = vpop.eup %257  ;;  %v171_v55 = vadd.f32 1e-05, %v167_v52 }
 0x19d   :  { %v173_v54 = vmul.f32 %v258_v53, %v170_v46  ;;  %vm179_vm3 = vweird.f32 %v258_v53 }
 0x19e   :  { %259 = vrsqrt.f32 %v171_v55  ;;  %vm180_vm5 = vmor %vm178_vm4, %vm179_vm3  ;;  %vm188_vm8 = vweird.f32 %v171_v55 }
 0x19f   :  { %v174_v56 = vmul.f32 %v258_v53, %v173_v54 }
 0x1a1   :  { %v175_v57 = vmul.f32 0.5, %v174_v56 }
 0x1a3   :  { %v176_v58 = vsub.f32 1.5, %v175_v57 }
 0x1a4   :  { %v260_v59 = vpop.eup %259 }
 0x1a5   :  { %v177_v60 = vmul.f32 %v258_v53, %v176_v58  ;;  %v183_v63 = vmul.f32 %v260_v59, %v171_v55  ;;  %vm189_vm6 = vweird.f32 %v260_v59 }
 0x1a6   :  { %vm190_vm9 = vmor %vm188_vm8, %vm189_vm6 }
 0x1a7   :  { %v181_v0 = vsel %vm180_vm5, %v258_v53, %v177_v60  ;;  %v184_v3 = vmul.f32 %v260_v59, %v183_v63 }
 0x1a8   :  { %v192_v2 = vmul.f32 %v181_v0, %v168_v61 }
 0x1a9   :  { %v185_v5 = vmul.f32 0.5, %v184_v3 }
 0x1aa   :  { %v197_v4 = vmul.f32 %v253_v62, %v192_v2 }
 0x1ab   :  { %v186_v7 = vsub.f32 1.5, %v185_v5 }
 0x1ac   :  { %v202_v6 = vadd.f32 %v254_v1, %v197_v4 }
 0x1ad   :  { %v187_v9 = vmul.f32 %v260_v59, %v186_v7 }
 0x1ae   :  { %v204_v8 = vpack.c.bf16 %v202_v6, %v202_v6 }
 0x1af   :  { %v191_v11 = vsel %vm190_vm9, %v260_v59, %v187_v9 }
 0x1b0   :  { %207 = vst.msk [vmem:[%s362_s7] sm:$0xf] %vm206_vm7, %v204_v8  ;;  %v193_v12 = vmul.f32 %v191_v11, %v169_v10 }
 0x1b2   :  { %v198_v13 = vmul.f32 %v253_v62, %v193_v12 }
 0x1b4   :  { %v203_v14 = vadd.f32 %v254_v1, %v198_v13 }
 0x1b6   :  { %v205_v15 = vpack.c.bf16 %v203_v14, %v203_v14 }
 0x1b8   :  { %208 = vst.msk [vmem:[%s362_s7 + $0x4] sm:$0xf] %vm206_vm7, %v205_v15 }

// kernel: decoder_forward.7
= control target key start
LH: loop header
LB: loop body
LE: loop exit
PB: predicated region body
PF: predicated region fallthrough
CT: control target
= control target key end

     0   :  { %s1097_s13 = smov 0   ;;  %s1099_s14 = smov 0   ;;  %s1217_s0 = inlined_call_operand.vmem [shape: bf16[2,8,32], index: 0, kind: input, shape index: {}]   ;;  %s1218_s1 = inlined_call_operand.vmem [shape: bf16[2,8,32], index: 1, kind: input, shape index: {}]   ;;  %s1219_s2 = inlined_call_operand.vmem [shape: bf16[32,32], index: 2, kind: input, shape index: {}]   ;;  %s1220_s3 = inlined_call_operand.vmem [shape: f32[1,32], index: 3, kind: input, shape index: {}]   ;;  %s1221_s4 = inlined_call_operand.vmem [shape: bf16[32,64], index: 4, kind: input, shape index: {}]   ;;  %s1222_s5 = inlined_call_operand.vmem [shape: f32[1,64], index: 5, kind: input, shape index: {}]   ;;  %s1223_s6 = inlined_call_operand.vmem [shape: bf16[32,32], index: 6, kind: input, shape index: {}]   ;;  %s1224_s7 = inlined_call_operand.vmem [shape: f32[1,32], index: 7, kind: input, shape index: {}]   ;;  %s1225_s8 = inlined_call_operand.vmem [shape: f32[1,32], index: 8, kind: input, shape index: {}]   ;;  %s1226_s9 = inlined_call_operand.vmem [shape: f32[1,32], index: 9, kind: input, shape index: {}]   ;;  %s1227_s10 = inlined_call_operand.vmem [shape: bf16[2,8,32], index: 10, kind: output, shape index: {}]  }
   0x1   :  { %s1101_s15 = smov 0  }
   0x2 LB: > { %s32_s16 = sadd.s32 1, %s1025_s14  ;;  %p900_p0 = scmp.ge.s32.totalorder %s1029_s15, 1  ;;  %s1029_s15 = sphi %s1101_s15, %s20_s15   ;;  %s1025_s14 = sphi %s1099_s14, %s1229_s14   ;;  %s1021_s13 = sphi %s1097_s13, %s1228_s13  }
   0x3   : > { %p34_p1 = scmp.ge.s32.totalorder %s32_s16, 2  ;;  %p339_p2 = scmp.lt.s32.totalorder %s1029_s15, 3 }
   0x5   : > { %s1231_s16 = smov (%p34_p1, %s32_s16), 0  ;;  %p340_p3 = pnand %p900_p0, %p339_p2 }
   0x6   : > { %p385_p4 = scmp.lt.s32.totalorder (!%p340_p3), %s1021_s13, 1  ;;  %s1031_s19 = smov (!%p340_p3), 96  }
   0x7   : > { %343 = sbr.rel (%p340_p3) target bundleno = 1488 (0x5d0), region = 60  ;;  %s1032_s20 = smov (!%p340_p3), 120  }
   0x8   : > { %s1033_s21 = smov (!%p340_p3), 112   ;;  %s1034_s22 = smov (!%p340_p3), 104  }
   0x9   : > { %s1035_s23 = smov (!%p340_p3), 88   ;;  %s1036_s24 = smov (!%p340_p3), 80  }
   0xa   : > { %s1037_s26 = smov (!%p340_p3), 72   ;;  %s1038_s27 = smov (!%p340_p3), 8  }
   0xb   : > { %s1040_s29 = smov (!%p340_p3), 24  }
   0xc   : > { %v942_v0 = vld [vmem:[%s1219_s2 + $0x8] sm:$0xff]  ;;  %v941_v2 = vld [vmem:[%s1219_s2] sm:$0xff]  ;;  %s1233_s13 = smov (!%p385_p4, %s1021_s13), 1  ;;  %vm426_vm0 = vcmask 261120   ;;  %vm481_vm1 = vcmask 64512   ;;  %vm521_vm2 = vcmask 1043456  }
   0xd   : > { %v944_v1 = vld [vmem:[%s1221_s4 + $0x8] sm:$0xff]  ;;  %436 = vmatpush.bf16.msra.mxu0 %v942_v0  ;;  %v943_v3 = vld [vmem:[%s1221_s4] sm:$0xff]  ;;  %s1127_s25 = sshll.u32 %s1233_s13, 2  ;;  %vm722_vm3 = vcmask 130048   ;;  %vm724_vm4 = vcmask 195584   ;;  %vm808_vm9 = vcmask 257024  }
   0xe   : > { %473 = vmatpush.bf16.msra.mxu1 %v944_v1  ;;  %s391_s28 = scalar_lea.vmem %s1217_s0, %s1127_s25  ;;  %s395_s11 = scalar_lea.vmem %s1218_s1, %s1127_s25  ;;  %v982_v6 = vld [vmem:[%s1220_s3] ss:$0 sm:$0xff] }
   0xf   : > { %v1133_v4 = vld [vmem:[%s391_s28] sm:$0xf]  ;;  %s1039_s28 = smov 16  }
  0x10   : > { %v405_v5 = vld [vmem:[%s395_s11] sm:$0xf] }
  0x11   : > { %437 = vmatpush.bf16.msra.mxu0 %v941_v2  ;;  %v983_v7 = vld [vmem:[%s1222_s5] ss:$0 sm:$0xff] }
  0x12   : > { %474 = vmatpush.bf16.msra.mxu1 %v943_v3 }
  0x14   : > { %912 = vmatmul.msk.bf16.vlgmr.msra.gmra.mxu0 %vm426_vm0, %v1133_v4 }
  0x15   : > { %921 = vmatmul.msk.bf16.vlgmr.msra.gmra.mxu1 %vm426_vm0, %v405_v5 }
  0x91   : > { %v439_v8 = vpop.f32.mrf.mxu0 }
  0x92   : > { %v476_v9 = vpop.f32.mrf.mxu1  ;;  %v440_v10 = vadd.f32 %v982_v6, %v439_v8 }
  0x93   : > { %v477_v11 = vadd.f32 %v983_v7, %v476_v9 }
  0x94   : > { %v443_v12 = vpack.c.bf16 %v440_v10, %v440_v10 }
  0x95   : > { %v480_v13 = vpack.c.bf16 %v477_v11, %v477_v11 }
  0x96   : > { %v539_v14 = vunpack.c.l.b16 %v443_v12 }
  0x97   : > { %v514_v15 = vunpack.c.l.b16 %v480_v13  ;;  %v486_v16 = vsel %vm481_vm1, %v480_v13, 0 }
  0x98   : > { %495 = vmatpush.bf16.xpose.msra.mxu2 %v486_v16  ;;  %v540_v17 = vpack.c.b16 %v539_v14, %v539_v14 }
  0x99   : > { %v1149_v18 = vpack.c.b16 %v514_v15, %v514_v15  ;;  %v441_v19 = vpop.f32.mrf.mxu0 }
  0x9a   : > { %v478_v20 = vpop.f32.mrf.mxu1  ;;  %541 = vrot.lane.b32.xlu2 %v540_v17, %s1032_s20 }
  0x9b   : > { %516 = vrot.lane.b32.xlu1 %v1149_v18, %s1031_s19 }
  0x9f   : > { %922 = vmatmul.msk.bf16.vlgmr.msra.gmra.mxu2 %vm481_vm1, %v443_v12 }
  0xa2   : > { %599 = vrot.lane.b32.xlu2 %v1149_v18, %s1033_s21 }
  0xa3   : > { %543 = vrot.lane.b32.xlu1 %v1149_v18, %s1032_s20 }
  0xaa   : > { %653 = vrot.lane.b32.xlu2 %v540_v17, %s1034_s22 }
  0xab   : > { %597 = vrot.lane.b32.xlu1 %v540_v17, %s1033_s21 }
  0xf4   : > { %v542_v21 = vpop.permute.xlu2 %541 }
  0xfc   : > { %v600_v22 = vpop.permute.xlu2 %599 }
  0xfd   : > { %v605_v23 = vsel %vm481_vm1, %v600_v22, 0 }
  0xfe   : > { %614 = vmatpush.bf16.xpose.msrb.mxu1 %v605_v23 }
 0x104   : > { %v654_v40 = vpop.permute.xlu2 %653 }
 0x10d   : > { %v517_v24 = vpop.permute.xlu1 %516 }
 0x10e   : > { %v523_v25 = vsel %vm521_vm2, %v517_v24, 0 }
 0x10f   : > { %532 = vmatpush.bf16.msra.mxu3 %v523_v25 }
 0x115   : > { %v544_v26 = vpop.permute.xlu1 %543 }
 0x116   : > { %v549_v27 = vsel %vm481_vm1, %v544_v26, 0 }
 0x117   : > { %558 = vmatpush.bf16.xpose.msrb.mxu3 %v549_v27 }
 0x11d   : > { %v598_v28 = vpop.permute.xlu1 %597 }
 0x11e   : > { %926 = vmatmul.msk.bf16.vlgmr.msrb.gmra.mxu1 %vm481_vm1, %v598_v28 }
 0x122   : > { %v497_v29 = vpop.f32.mrf.mxu2 }
 0x123   : > { %v501_v30 = vsel %vm481_vm1, %v497_v29, -inf }
 0x124   : > { %502 = vmax.xlane.f32.xlu0 %v501_v30 }
 0x12a   : > { %v499_v31 = vpop.f32.mrf.mxu2 }
 0x12b   : > { %v946_v31 = vld [vmem:[%s1223_s6 + $0x8] sm:$0xff] }
 0x12c   : > { %756 = vmatpush.bf16.msra.mxu1 %v946_v31 }
 0x197   : > { %v503_v32 = vpop.xlane.xlu0 %502 }
 0x198   : > { %v504_v33 = vsub.f32 %v497_v29, %v503_v32  ;;  %v945_v32 = vld [vmem:[%s1223_s6] sm:$0xff] }
 0x199   : > { %757 = vmatpush.bf16.msra.mxu1 %v945_v32 }
 0x19a   : > { %v505_v34 = vmul.f32 1.442695, %v504_v33 }
 0x19b   : > { %v616_v35 = vpop.f32.mrf.mxu1 }
 0x19c   : > { %987 = vpow2.f32 %v505_v34  ;;  %v620_v36 = vsel %vm481_vm1, %v616_v35, -inf }
 0x19d   : > { %621 = vmax.xlane.f32.xlu2 %v620_v36 }
 0x1a2   : > { %v988_v37 = vpop.eup %987 }
 0x1a3   : > { %v618_v38 = vpop.f32.mrf.mxu1  ;;  %v507_v39 = vsel %vm481_vm1, %v988_v37, 0.0 }
 0x1a4   : > { %508 = vadd.xlane.f32.xlu0 %v507_v39 }
 0x1b8   : > { %655 = vrot.lane.b32.xlu0 %v1149_v18, %s1034_s22 }
 0x210   : > { %v622_v41 = vpop.xlane.xlu2 %621 }
 0x211   : > { %v623_v42 = vsub.f32 %v616_v35, %v622_v41  ;;  %v763_v41 = vunpack.c.l.bf16 %v1133_v4 }
 0x213   : > { %v624_v43 = vmul.f32 1.442695, %v623_v42 }
 0x215   : > { %989 = vpow2.f32 %v624_v43 }
 0x217   : > { %v509_v44 = vpop.xlane.xlu0 %508 }
 0x218   : > { %991 = vrcp.f32 %v509_v44 }
 0x21b   : > { %v990_v45 = vpop.eup %989 }
 0x21c   : > { %v626_v46 = vsel %vm481_vm1, %v990_v45, 0.0 }
 0x21d   : > { %627 = vadd.xlane.f32.xlu2 %v626_v46 }
 0x21e   : > { %v992_v47 = vpop.eup %991 }
 0x21f   : > { %v511_v48 = vmul.f32 %v992_v47, %v988_v37 }
 0x221   : > { %v512_v49 = vpack.c.bf16 %v511_v48, %v511_v48 }
 0x223   : > { %923 = vmatmul.msk.bf16.vlgmr.msra.gmra.mxu3 %vm481_vm1, %v512_v49  ;;  %v1041_v49 = vmov 32.0  }
 0x22a   : > { %v656_v50 = vpop.permute.xlu0 %655 }
 0x22b   : > { %v661_v51 = vsel %vm481_vm1, %v656_v50, 0 }
 0x22c   : > { %670 = vmatpush.bf16.xpose.msra.mxu3 %v661_v51 }
 0x233   : > { %924 = vmatmul.msk.bf16.vlgmr.msrb.gmra.mxu3 %vm481_vm1, %v542_v21 }
 0x243   : > { %928 = vmatmul.msk.bf16.vlgmr.msra.gmra.mxu3 %vm481_vm1, %v654_v40  ;;  %v984_v40 = vld [vmem:[%s1224_s7] ss:$0 sm:$0xff] }
 0x290   : > { %v628_v9 = vpop.xlane.xlu2 %627 }
 0x2a6   : > { %v1168_v52 = vpop.f32.mrf.mxu3 }
 0x2ae   : > { %v536_v53 = vpop.f32.mrf.mxu3 }
 0x2b6   : > { %v560_v54 = vpop.f32.mrf.mxu3 }
 0x2b7   : > { %v564_v55 = vsel %vm481_vm1, %v560_v54, -inf }
 0x2b8   : > { %565 = vmax.xlane.f32.xlu1 %v564_v55 }
 0x2be   : > { %v562_v56 = vpop.f32.mrf.mxu3 }
 0x2c6   : > { %v672_v57 = vpop.f32.mrf.mxu3 }
 0x2c7   : > { %v676_v58 = vsel %vm481_vm1, %v672_v57, -inf }
 0x2c8   : > { %677 = vmax.xlane.f32.xlu0 %v676_v58 }
 0x2ce   : > { %v674_v59 = vpop.f32.mrf.mxu3 }
 0x2d1   : > { %576 = vrot.lane.b32.xlu1 %v1149_v18, %s1035_s23 }
 0x32b   : > { %v566_v60 = vpop.xlane.xlu1 %565 }
 0x32c   : > { %v567_v61 = vsub.f32 %v560_v54, %v566_v60 }
 0x32e   : > { %v568_v62 = vmul.f32 1.442695, %v567_v61 }
 0x330   : > { %993 = vpow2.f32 %v568_v62 }
 0x336   : > { %v994_v63 = vpop.eup %993 }
 0x337   : > { %v570_v0 = vsel %vm481_vm1, %v994_v63, 0.0 }
 0x338   : > { %571 = vadd.xlane.f32.xlu2 %v570_v0 }
 0x33b   : > { %v678_v1 = vpop.xlane.xlu0 %677 }
 0x33c   : > { %v679_v2 = vsub.f32 %v672_v57, %v678_v1 }
 0x33e   : > { %v680_v3 = vmul.f32 1.442695, %v679_v2 }
 0x340   : > { %995 = vpow2.f32 %v680_v3 }
 0x341   : > { %997 = vrcp.f32 %v628_v9  ;;  %v986_v9 = vld [vmem:[%s1226_s9] ss:$0 sm:$0xff] }
 0x343   : > { %v577_v5 = vpop.permute.xlu1 %576 }
 0x344   : > { %v582_v6 = vsel %vm521_vm2, %v577_v5, 0 }
 0x345   : > { %591 = vmatpush.bf16.msrb.mxu0 %v582_v6 }
 0x346   : > { %v996_v7 = vpop.eup %995 }
 0x347   : > { %v682_v8 = vsel %vm481_vm1, %v996_v7, 0.0  ;;  %v998_v11 = vpop.eup %997 }
 0x348   : > { %683 = vadd.xlane.f32.xlu0 %v682_v8  ;;  %v630_v13 = vmul.f32 %v998_v11, %v990_v45 }
 0x34a   : > { %v631_v19 = vpack.c.bf16 %v630_v13, %v630_v13 }
 0x350   : > { %632 = vrot.lane.b32.xlu2 %v1149_v18, %s1036_s24 }
 0x35c   : > { %688 = vrot.lane.b32.xlu0 %v1149_v18, %s1037_s26  ;;  %s402_s26 = scalar_lea.vmem %s1227_s10, %s1127_s25 }
 0x3ab   : > { %v572_v10 = vpop.xlane.xlu2 %571 }
 0x3ac   : > { %999 = vrcp.f32 %v572_v10 }
 0x3b2   : > { %v1000_v12 = vpop.eup %999 }
 0x3b3   : > { %v574_v14 = vmul.f32 %v1000_v12, %v994_v63  ;;  %v633_v15 = vpop.permute.xlu2 %632 }
 0x3b4   : > { %v638_v16 = vsel %vm521_vm2, %v633_v15, 0 }
 0x3b5   : > { %647 = vmatpush.bf16.msrb.mxu2 %v638_v16  ;;  %v575_v17 = vpack.c.bf16 %v574_v14, %v574_v14 }
 0x3b7   : > { %925 = vmatmul.msk.bf16.vlgmr.msrb.gmra.mxu0 %vm481_vm1, %v575_v17 }
 0x3b8   : > { %927 = vmatmul.msk.bf16.vlgmr.msrb.gmra.mxu2 %vm481_vm1, %v631_v19 }
 0x3bb   : > { %v684_v20 = vpop.xlane.xlu0 %683 }
 0x3bc   : > { %1001 = vrcp.f32 %v684_v20 }
 0x3bd   : > { %1003 = vrcp.f32 %v1041_v49 }
 0x3c2   : > { %v1002_v18 = vpop.eup %1001 }
 0x3c3   : > { %v686_v21 = vmul.f32 %v1002_v18, %v996_v7  ;;  %v1004_v50 = vpop.eup %1003  ;;  %v985_v7 = vld [vmem:[%s1225_s8] ss:$0 sm:$0xff] }
 0x3c4   : > { %v771_v51 = vmul.f32 32.0, %v1004_v50  ;;  %vm775_vm5 = vweird.f32 %v1004_v50 }
 0x3c5   : > { %v687_v24 = vpack.c.bf16 %v686_v21, %v686_v21 }
 0x3ce   : > { %v689_v22 = vpop.permute.xlu0 %688 }
 0x3cf   : > { %v694_v23 = vsel %vm521_vm2, %v689_v22, 0 }
 0x3d0   : > { %703 = vmatpush.bf16.msra.mxu0 %v694_v23 }
 0x3d3   : > { %929 = vmatmul.msk.bf16.vlgmr.msra.gmra.mxu0 %vm481_vm1, %v687_v24 }
 0x434   : > { %v593_v25 = vpop.f32.mrf.mxu0 }
 0x435   : > { %710 = vrot.lane.b32.xlu1 %v593_v25, %s1038_s27 }
 0x43b   : > { %v649_v26 = vpop.f32.mrf.mxu2 }
 0x43c   : > { %v595_v27 = vpop.f32.mrf.mxu0 }
 0x43d   : > { %714 = vrot.lane.b32.xlu1 %v649_v26, %s1039_s28 }
 0x443   : > { %v651_v28 = vpop.f32.mrf.mxu2 }
 0x450   : > { %v705_v29 = vpop.f32.mrf.mxu0 }
 0x451   : > { %718 = vrot.lane.b32.xlu2 %v705_v29, %s1040_s29 }
 0x458   : > { %v707_v30 = vpop.f32.mrf.mxu0 }
 0x4a7   : > { %v711_v33 = vpop.permute.xlu1 %710 }
 0x4a8   : > { %v721_v34 = vsel %vm481_vm1, %v1168_v52, %v711_v33  ;;  %v772_v52 = vsub.f32 1.0, %v771_v51 }
 0x4aa   : > { %v773_v53 = vmul.f32 %v1004_v50, %v772_v52 }
 0x4ab   : > { %v719_v36 = vpop.permute.xlu2 %718 }
 0x4ac   : > { %v774_v54 = vadd.f32 %v1004_v50, %v773_v53 }
 0x4ae   : > { %v776_v4 = vsel %vm775_vm5, %v1004_v50, %v774_v54 }
 0x4af   : > { %v715_v35 = vpop.permute.xlu1 %714 }
 0x4b0   : > { %v723_v37 = vsel %vm722_vm3, %v721_v34, %v715_v35 }
 0x4b1   : > { %v725_v38 = vsel %vm724_vm4, %v723_v37, %v719_v36 }
 0x4b2   : > { %v726_v39 = vpack.c.bf16 %v725_v38, %v725_v38 }
 0x4b4   : > { %938 = vmatmul.msk.bf16.vlgmr.msra.gmra.mxu1 %vm426_vm0, %v726_v39 }
 0x531   : > { %v759_v42 = vpop.f32.mrf.mxu1 }
 0x532   : > { %v760_v43 = vadd.f32 %v984_v40, %v759_v42 }
 0x534   : > { %v764_v44 = vadd.f32 %v763_v41, %v760_v43 }
 0x536   : > { %v767_v45 = vsel %vm426_vm0, %v764_v44, 0.0  ;;  %v778_v46 = vmul.f32 %v764_v44, %v764_v44 }
 0x537   : > { %768 = vadd.xlane.f32.xlu0 %v767_v45 }
 0x538   : > { %v779_v47 = vsel %vm426_vm0, %v778_v46, 0.0 }
 0x539   : > { %v761_v48 = vpop.f32.mrf.mxu1  ;;  %780 = vadd.xlane.f32.xlu1 %v779_v47 }
 0x5aa   : > { %v769_v55 = vpop.xlane.xlu0 %768 }
 0x5ab   : > { %v777_v56 = vmul.f32 %v776_v4, %v769_v55 }
 0x5ac   : > { %v781_v57 = vpop.xlane.xlu1 %780 }
 0x5ad   : > { %v783_v58 = vmul.f32 %v777_v56, %v777_v56  ;;  %v782_v59 = vmul.f32 %v781_v57, %v776_v4  ;;  %v786_v6 = vsub.f32 %v764_v44, %v777_v56 }
 0x5af   : > { %v784_v60 = vsub.f32 %v782_v59, %v783_v58 }
 0x5b1   : > { %v785_v61 = vmax.f32 %v784_v60, 0.0 }
 0x5b3   : > { %v787_v62 = vadd.f32 1e-05, %v785_v61 }
 0x5b5   : > { %1005 = vrsqrt.f32 %v787_v62  ;;  %vm794_vm7 = vweird.f32 %v787_v62 }
 0x5bb   : > { %v1006_v63 = vpop.eup %1005 }
 0x5bc   : > { %v789_v0 = vmul.f32 %v1006_v63, %v787_v62  ;;  %vm795_vm6 = vweird.f32 %v1006_v63 }
 0x5bd   : > { %vm796_vm8 = vmor %vm794_vm7, %vm795_vm6 }
 0x5be   : > { %v790_v1 = vmul.f32 %v1006_v63, %v789_v0 }
 0x5c0   : > { %v791_v2 = vmul.f32 0.5, %v790_v1 }
 0x5c2   : > { %v792_v3 = vsub.f32 1.5, %v791_v2 }
 0x5c4   : > { %v793_v5 = vmul.f32 %v1006_v63, %v792_v3 }
 0x5c6   : > { %v797_v8 = vsel %vm796_vm8, %v1006_v63, %v793_v5 }
 0x5c7   : > { %v798_v10 = vmul.f32 %v797_v8, %v786_v6 }
 0x5c9   : > { %v802_v11 = vmul.f32 %v985_v7, %v798_v10 }
 0x5cb   : > { %v806_v12 = vadd.f32 %v986_v9, %v802_v11 }
 0x5cd   : > { %v807_v13 = vpack.c.bf16 %v806_v12, %v806_v12 }
 0x5cf   : > { %809 = vst.msk [vmem:[%s402_s26] sm:$0xf] %vm808_vm9, %v807_v13 }
 0x5d0 PF: > { %s20_s15 = sadd.s32 1, %s1029_s15   ;;  %s1228_s13 = smov %s1025_s14 }
 0x5d1   : > { %p17_p5 = scmp.ge.s32.totalorder %s20_s15, 4   ;;  %s1229_s14 = smov %s1231_s16 }
 0x5d3   :  { %19 = sbr.rel (!%p17_p5) target bundleno = 2 (0x2), region = 93 }

</bundles_post_ra>
